<compile_context>
chip_gen: v5e
topology: v5e:2x2
jax: 0.10.0
libtpu: 0.0.40
codegen_flags: <defaults>
</compile_context>

<pallas_src>
import math

import jax
import jax.numpy as jnp
from jax.experimental import pallas as pl
from jax.experimental.pallas import tpu as pltpu

# ----------------------------- configuration -------------------------------
NUM_HEADS = 4
OUT_FEATURES = 32
INPUT_DIM = 32
N_AGENTS = 8
NEGATIVE_SLOPE = 0.2
SELF_LOOP_TYPE = 1      # 0: no self-loop, 1: force self-loop, else: keep adj
NORMALIZE = True
AVERAGE = False
USE_BIAS = True
DROPOUT = 0.0           # eval mode -> F.dropout is the identity


# ------------------------------- kernel ------------------------------------
def graph_attention_kernel(x_ref, adjrep_ref, w_ref, ai_ref, aj_ref, delta_ref,
                           gind_ref, sumblk_ref, rep_ref, gmask_ref, hmask_ref,
                           bias_ref, out_ref):
    """One macro-batch of G graphs, fully batched (no per-graph loop).

    Index conventions (all built wrapper-side):
      rows of x/att/out        : (g, i)        size G*N
      attention columns        : (k, j)        size H*N      (head-major)
      output columns           : (k, f)        size H*F
      big contraction columns  : (k, g', j')   size H*G*N
    """
    # ---- projections: whole macro-batch in single MXU ops
    h_all = jnp.dot(x_ref[...], w_ref[...],
                    preferred_element_type=jnp.float32)                 # [GN, HF]

    # ci[(g,i),(k,j)] = <h_{g,i}, a_i[k]>  (constant over j)
    ci = jnp.dot(h_all, ai_ref[...], preferred_element_type=jnp.float32)   # [GN, HN]

    # cj[(g,i),(k,j)] = <h_{g,j}, a_j[k]>  (constant over i within a graph):
    #   cj_v[(g,j'),(k,j)] = <h_{g,j'}, a_j[k]> * (j'==j)          (masked matmul)
    #   cj = graph_block_ones @ cj_v                                (broadcast over i)
    cj_v = jnp.dot(h_all, aj_ref[...],
                   preferred_element_type=jnp.float32) * delta_ref[...]    # [GN, HN]
    cj = jnp.dot(gind_ref[...], cj_v, preferred_element_type=jnp.float32)  # [GN, HN]

    adj_rep = adjrep_ref[...]                                              # [GN, HN]

    # ---- attention elementwise chain, batched over all graphs at once
    coeff = ci + cj
    e = jnp.where(coeff >= 0, coeff, NEGATIVE_SLOPE * coeff)               # LeakyReLU
    att = e * adj_rep

    # softmax over the neighbour axis j inside each head block (dim=1 in torch).
    # A row-global max is a valid stabiliser: softmax is shift-invariant per block.
    m = jnp.max(att, axis=1, keepdims=True)                                # [GN, 1]
    p = jnp.exp(att - m)
    denom = jnp.dot(p, sumblk_ref[...], preferred_element_type=jnp.float32)
    if NORMALIZE:
        # approx reciprocal is safe ONLY because the uniform per-block scale error
        # cancels exactly in the exact renormalisation below.
        att = p * pl.reciprocal(denom, approx=True)
    else:
        att = p / denom
    att = att * adj_rep

    if NORMALIZE:
        if SELF_LOOP_TYPE != 1:
            att = att + 1e-15
        denom2 = jnp.dot(att, sumblk_ref[...], preferred_element_type=jnp.float32)
        att = att / denom2           # exact: this scale is not renormalised later
        att = att * adj_rep

    # dropout p=0.0 / eval mode -> identity
    # TODO(synk): training-mode dropout would use pltpu.prng_* masks here.

    # ---- single graph-block-diagonal output matmul (all graphs, all heads)
    # att_full[(g,i),(k,g',j)] = att[(g,i),(k,j)] * (g==g')
    att_full = jnp.dot(att, rep_ref[...],
                       preferred_element_type=jnp.float32) * gmask_ref[...]   # [GN, HGN]
    # h_bd[(k,g',j),(k',f)] = h_all[(g',j),(k',f)] * (k==k')
    h_bd = jnp.concatenate([h_all] * NUM_HEADS, axis=0) * hmask_ref[...]      # [HGN, HF]
    out = jnp.dot(att_full, h_bd, preferred_element_type=jnp.float32)         # [GN, HF]

    if USE_BIAS and not AVERAGE:
        out = out + bias_ref[...]

    out_ref[...] = out.astype(out_ref.dtype)       # one lane-dense full-tile store


# ------------------------------- wrapper ------------------------------------
def _default_grid_steps():
    """One grid step per TensorCore: 1 on v5e/v6e, 2 on v7x (2 TCs/chip)."""
    try:
        kind = jax.devices()[0].device_kind.lower()
    except Exception:
        return 1
    return 2 if "7" in kind else 1


def graph_attention(X, adj, W, a_i, a_j, bias, *, num_grid_steps=None):
    """X: [B, N, Din], adj: [B, N, N], W: [Din, H*F], a_i/a_j: [H, F],
    bias: [H*F] (or [F] if AVERAGE)."""
    B, N, Din = X.shape
    H, F = NUM_HEADS, OUT_FEATURES
    HF, HN = H * F, H * N

    steps = num_grid_steps if num_grid_steps is not None else _default_grid_steps()
    if steps < 1 or B % steps != 0:
        steps = 1                       # e.g. prime B: fall back to a single step
    G = B // steps
    GN, HGN = G * N, H * G * N

    f32 = jnp.float32

    # ---- wrapper-side (plain-JAX) constant packing; resident across the grid ----
    # self-loop handling + per-head adjacency replication: adj_rep[(b,i),(k,j)] = adj_eff[b,i,j]
    eye = jnp.eye(N, dtype=f32)
    if SELF_LOOP_TYPE == 0:
        adj_eff = adj * (1.0 - eye)
    elif SELF_LOOP_TYPE == 1:
        adj_eff = eye + adj * (1.0 - eye)
    else:
        adj_eff = adj
    adj_rep = jnp.tile(adj_eff.astype(f32), (1, 1, H)).reshape(B * N, HN)

    # head-block-diagonal a_i / a_j expansions: [(k',f),(k,j)] = a[k,f] * (k==k')
    eye_h = jnp.eye(H, dtype=f32)
    ai_exp = jnp.broadcast_to(a_i[:, :, None, None] * eye_h[:, None, :, None],
                              (H, F, H, N)).reshape(HF, HN).astype(f32)
    aj_exp = jnp.broadcast_to(a_j[:, :, None, None] * eye_h[:, None, :, None],
                              (H, F, H, N)).reshape(HF, HN).astype(f32)

    # delta_mask[(g,j'),(k,j)] = (j'==j)  -- column selector for the coeff_j path
    delta_mask = (jnp.arange(GN)[:, None] % N == jnp.arange(HN)[None, :] % N).astype(f32)
    # graph_ind[(g,i),(g',j')] = (g==g')  -- block-diagonal ones (broadcast over i)
    graph_ind = (jnp.arange(GN)[:, None] // N == jnp.arange(GN)[None, :] // N).astype(f32)
    # sum_blk[(k',j'),(k,j)] = (k'==k)    -- per-head segmented row sums via MXU
    sum_blk = (jnp.arange(HN)[:, None] // N == jnp.arange(HN)[None, :] // N).astype(f32)

    # big-contraction column index (k', g', j') of size H*G*N
    col = jnp.arange(HGN)
    colk, colg, colj = col // GN, (col // N) % G, col % N
    rowk, rowj = jnp.arange(HN) // N, jnp.arange(HN) % N
    # rep_mat[(k,j),(k',g',j')] = (k==k')(j==j')  -- lane replication of att per graph
    rep_mat = ((rowk[:, None] == colk[None, :]) &
               (rowj[:, None] == colj[None, :])).astype(f32)               # [HN, HGN]
    # graph_mask[(g,i),(k',g',j')] = (g==g')
    graph_mask = ((jnp.arange(GN) // N)[:, None] == colg[None, :]).astype(f32)  # [GN, HGN]
    # head_mask[(k',g',j'),(k,f)] = (k'==k)
    head_mask = (colk[:, None] == (jnp.arange(HF) // F)[None, :]).astype(f32)   # [HGN, HF]

    if USE_BIAS and not AVERAGE:
        bias2d = bias.reshape(1, HF).astype(f32)
    else:
        bias2d = jnp.zeros((1, HF), f32)

    X2d = X.reshape(B * N, Din).astype(f32)       # graphs stacked on the sublane axis

    out2d = pl.pallas_call(
        graph_attention_kernel,
        out_shape=jax.ShapeDtypeStruct((B * N, HF), jnp.float32),
        grid=(steps,),
        in_specs=[
            pl.BlockSpec((GN, Din), lambda b: (b, 0)),     # X      (per macro-batch)
            pl.BlockSpec((GN, HN), lambda b: (b, 0)),      # adj_rep(per macro-batch)
            pl.BlockSpec((Din, HF), lambda b: (0, 0)),     # W           (resident)
            pl.BlockSpec((HF, HN), lambda b: (0, 0)),      # ai_exp      (resident)
            pl.BlockSpec((HF, HN), lambda b: (0, 0)),      # aj_exp      (resident)
            pl.BlockSpec((GN, HN), lambda b: (0, 0)),      # delta_mask  (resident)
            pl.BlockSpec((GN, GN), lambda b: (0, 0)),      # graph_ind   (resident)
            pl.BlockSpec((HN, HN), lambda b: (0, 0)),      # sum_blk     (resident)
            pl.BlockSpec((HN, HGN), lambda b: (0, 0)),     # rep_mat     (resident)
            pl.BlockSpec((GN, HGN), lambda b: (0, 0)),     # graph_mask  (resident)
            pl.BlockSpec((HGN, HF), lambda b: (0, 0)),     # head_mask   (resident)
            pl.BlockSpec((1, HF), lambda b: (0, 0)),       # bias        (resident)
        ],
        out_specs=pl.BlockSpec((GN, HF), lambda b: (b, 0)),
        compiler_params=pltpu.CompilerParams(
            dimension_semantics=("parallel",)),            # megacore on v7x
    )(X2d, adj_rep, W.astype(f32), ai_exp, aj_exp, delta_mask, graph_ind,
      sum_blk, rep_mat, graph_mask, head_mask, bias2d)

    if AVERAGE:
        out = out2d.reshape(B, N, H, F).mean(axis=2)       # plain-JAX epilogue
        if USE_BIAS:
            out = out + bias.reshape(1, 1, F)
        return out
    return out2d.reshape(B, N, HF)


# ------------------------------ pure-JAX ref ---------------------------------
def graph_attention_ref(X, adj, W, a_i, a_j, bias):
    """Single-graph reference; mirrors the PyTorch forward exactly."""
    N = X.shape[0]
    H, F = NUM_HEADS, OUT_FEATURES
    h = (X @ W).reshape(N, H, F)
    eye = jnp.eye(N, dtype=adj.dtype)
    if SELF_LOOP_TYPE == 0:
        adj_eff = adj * (1.0 - eye)
    elif SELF_LOOP_TYPE == 1:
        adj_eff = eye + adj * (1.0 - eye)
    else:
        adj_eff = adj
    ci = jnp.einsum('nhf,hf->nh', h, a_i)
    cj = jnp.einsum('nhf,hf->nh', h, a_j)
    coeff = ci[:, None, :] + cj[None, :, :]                   # [N, N, H]
    e = jnp.where(coeff >= 0, coeff, NEGATIVE_SLOPE * coeff)
    A = adj_eff[:, :, None]
    att = e * A
    att = jax.nn.softmax(att, axis=1)
    att = att * A
    if NORMALIZE:
        if SELF_LOOP_TYPE != 1:
            att = att + 1e-15
        att = att / att.sum(axis=1, keepdims=True)
        att = att * A
    out = jnp.einsum('ijh,jhf->ihf', att, h)                  # [N, H, F]
    if AVERAGE:
        out = out.mean(axis=1)
        return out + (bias[:F] if USE_BIAS else 0.0)
    out = out.reshape(N, H * F)
    return out + (bias if USE_BIAS else 0.0)


# --------------------------------- main --------------------------------------
if __name__ == "__main__":
    key = jax.random.PRNGKey(0)
    kx, kadj, kw, kai, kaj, kb = jax.random.split(key, 6)

    B = 16                               # batch of graphs / timesteps
    HF = NUM_HEADS * OUT_FEATURES
    X = jax.random.normal(kx, (B, N_AGENTS, INPUT_DIM), jnp.float32)
    adj = (jax.random.uniform(kadj, (B, N_AGENTS, N_AGENTS)) > 0.5).astype(jnp.float32)

    gain = math.sqrt(2.0)  # nn.init.calculate_gain('relu')
    std_w = gain * math.sqrt(2.0 / (INPUT_DIM + HF))
    W = std_w * jax.random.normal(kw, (INPUT_DIM, HF), jnp.float32)
    std_a = gain * math.sqrt(2.0 / (OUT_FEATURES + NUM_HEADS))
    a_i = std_a * jax.random.normal(kai, (NUM_HEADS, OUT_FEATURES), jnp.float32)
    a_j = std_a * jax.random.normal(kaj, (NUM_HEADS, OUT_FEATURES), jnp.float32)
    bias = 0.1 * jax.random.normal(kb, (HF,), jnp.float32)

    out = graph_attention(X, adj, W, a_i, a_j, bias)
    out = jax.block_until_ready(out)

    ref = jax.vmap(lambda x, a: graph_attention_ref(x, a, W, a_i, a_j, bias))(X, adj)
    assert out.shape == ref.shape, (out.shape, ref.shape)
    max_err = float(jnp.max(jnp.abs(out - ref)))
    assert jnp.allclose(out, ref, rtol=1e-4, atol=1e-4), max_err

    print("KERNEL_OK")
</pallas_src>

<mosaic_0001>
module attributes {stable_mosaic.version = 11 : i64} {
  func.func @graph_attention_kernel(%arg0: i32, %arg1: memref<128x32xf32, #tpu.memory_space<vmem>>, %arg2: memref<128x32xf32, #tpu.memory_space<vmem>>, %arg3: memref<32x128xf32, #tpu.memory_space<vmem>>, %arg4: memref<128x32xf32, #tpu.memory_space<vmem>>, %arg5: memref<128x32xf32, #tpu.memory_space<vmem>>, %arg6: memref<128x32xf32, #tpu.memory_space<vmem>>, %arg7: memref<128x128xf32, #tpu.memory_space<vmem>>, %arg8: memref<32x32xf32, #tpu.memory_space<vmem>>, %arg9: memref<32x512xf32, #tpu.memory_space<vmem>>, %arg10: memref<128x512xf32, #tpu.memory_space<vmem>>, %arg11: memref<512x128xf32, #tpu.memory_space<vmem>>, %arg12: memref<1x128xf32, #tpu.memory_space<vmem>>, %arg13: memref<128x128xf32, #tpu.memory_space<vmem>>) attributes {dimension_semantics = [#tpu.dimension_semantics<parallel>], iteration_bounds = array<i64: 1>, scalar_prefetch = 0 : i64, scratch_operands = 0 : i64, tpu.core_type = #tpu.core_type<tc>, window_params = [{transform_indices = @transform_0, window_bounds = array<i64: 128, 32>}, {transform_indices = @transform_1, window_bounds = array<i64: 128, 32>}, {pipeline_mode = #tpu.pipeline_mode<synchronous>, transform_indices = @transform_2, window_bounds = array<i64: 32, 128>}, {pipeline_mode = #tpu.pipeline_mode<synchronous>, transform_indices = @transform_3, window_bounds = array<i64: 128, 32>}, {pipeline_mode = #tpu.pipeline_mode<synchronous>, transform_indices = @transform_4, window_bounds = array<i64: 128, 32>}, {pipeline_mode = #tpu.pipeline_mode<synchronous>, transform_indices = @transform_5, window_bounds = array<i64: 128, 32>}, {pipeline_mode = #tpu.pipeline_mode<synchronous>, transform_indices = @transform_6, window_bounds = array<i64: 128, 128>}, {pipeline_mode = #tpu.pipeline_mode<synchronous>, transform_indices = @transform_7, window_bounds = array<i64: 32, 32>}, {pipeline_mode = #tpu.pipeline_mode<synchronous>, transform_indices = @transform_8, window_bounds = array<i64: 32, 512>}, {pipeline_mode = #tpu.pipeline_mode<synchronous>, transform_indices = @transform_9, window_bounds = array<i64: 128, 512>}, {pipeline_mode = #tpu.pipeline_mode<synchronous>, transform_indices = @transform_10, window_bounds = array<i64: 512, 128>}, {pipeline_mode = #tpu.pipeline_mode<synchronous>, transform_indices = @transform_11, window_bounds = array<i64: 1, 128>}, {transform_indices = @transform_12, window_bounds = array<i64: 128, 128>}]} {
    %c0 = arith.constant 0 : index
    %c0_0 = arith.constant 0 : index
    %0 = vector.load %arg1[%c0, %c0_0] : memref<128x32xf32, #tpu.memory_space<vmem>>, vector<128x32xf32>
    %c0_1 = arith.constant 0 : index
    %c0_2 = arith.constant 0 : index
    %1 = vector.load %arg3[%c0_1, %c0_2] : memref<32x128xf32, #tpu.memory_space<vmem>>, vector<32x128xf32>
    %cst = arith.constant dense<0.000000e+00> : vector<128x128xf32>
    %2 = tpu.matmul %0, %1, %cst {dimension_numbers = #tpu.dot_dimension_numbers<[1], [0], [0], [1], [0, 0, 1, 1], [], []>} : vector<128x32xf32>, vector<32x128xf32>, vector<128x128xf32> -> vector<128x128xf32>
    %c0_3 = arith.constant 0 : index
    %c0_4 = arith.constant 0 : index
    %3 = vector.load %arg4[%c0_3, %c0_4] : memref<128x32xf32, #tpu.memory_space<vmem>>, vector<128x32xf32>
    %cst_5 = arith.constant dense<0.000000e+00> : vector<128x32xf32>
    %4 = tpu.matmul %2, %3, %cst_5 {dimension_numbers = #tpu.dot_dimension_numbers<[1], [0], [0], [1], [0, 0, 1, 1], [], []>} : vector<128x128xf32>, vector<128x32xf32>, vector<128x32xf32> -> vector<128x32xf32>
    %c0_6 = arith.constant 0 : index
    %c0_7 = arith.constant 0 : index
    %5 = vector.load %arg5[%c0_6, %c0_7] : memref<128x32xf32, #tpu.memory_space<vmem>>, vector<128x32xf32>
    %cst_8 = arith.constant dense<0.000000e+00> : vector<128x32xf32>
    %6 = tpu.matmul %2, %5, %cst_8 {dimension_numbers = #tpu.dot_dimension_numbers<[1], [0], [0], [1], [0, 0, 1, 1], [], []>} : vector<128x128xf32>, vector<128x32xf32>, vector<128x32xf32> -> vector<128x32xf32>
    %c0_9 = arith.constant 0 : index
    %c0_10 = arith.constant 0 : index
    %7 = vector.load %arg6[%c0_9, %c0_10] : memref<128x32xf32, #tpu.memory_space<vmem>>, vector<128x32xf32>
    %8 = arith.mulf %6, %7 : vector<128x32xf32>
    %c0_11 = arith.constant 0 : index
    %c0_12 = arith.constant 0 : index
    %9 = vector.load %arg7[%c0_11, %c0_12] : memref<128x128xf32, #tpu.memory_space<vmem>>, vector<128x128xf32>
    %cst_13 = arith.constant dense<0.000000e+00> : vector<128x32xf32>
    %10 = tpu.matmul %9, %8, %cst_13 {dimension_numbers = #tpu.dot_dimension_numbers<[1], [0], [0], [1], [0, 0, 1, 1], [], []>} : vector<128x128xf32>, vector<128x32xf32>, vector<128x32xf32> -> vector<128x32xf32>
    %c0_14 = arith.constant 0 : index
    %c0_15 = arith.constant 0 : index
    %11 = vector.load %arg2[%c0_14, %c0_15] : memref<128x32xf32, #tpu.memory_space<vmem>>, vector<128x32xf32>
    %12 = arith.addf %4, %10 : vector<128x32xf32>
    %cst_16 = arith.constant 0.000000e+00 : f32
    %13 = vector.broadcast %cst_16 : f32 to vector<128x32xf32>
    %14 = arith.cmpf oge, %12, %13 : vector<128x32xf32>
    %cst_17 = arith.constant 2.000000e-01 : f32
    %15 = vector.broadcast %cst_17 : f32 to vector<128x32xf32>
    %16 = arith.mulf %15, %12 : vector<128x32xf32>
    %17 = arith.select %14, %12, %16 : vector<128x32xi1>, vector<128x32xf32>
    %18 = arith.mulf %17, %11 : vector<128x32xf32>
    %cst_18 = arith.constant dense<0xFF800000> : vector<128xf32>
    %19 = vector.multi_reduction <maximumf>, %18, %cst_18 [1] : vector<128x32xf32> to vector<128xf32>
    %20 = vector.shape_cast %19 : vector<128xf32> to vector<128x1xf32>
    %21 = vector.broadcast %20 : vector<128x1xf32> to vector<128x32xf32>
    %22 = arith.subf %18, %21 : vector<128x32xf32>
    %23 = math.exp %22 : vector<128x32xf32>
    %c0_19 = arith.constant 0 : index
    %c0_20 = arith.constant 0 : index
    %24 = vector.load %arg8[%c0_19, %c0_20] : memref<32x32xf32, #tpu.memory_space<vmem>>, vector<32x32xf32>
    %cst_21 = arith.constant dense<0.000000e+00> : vector<128x32xf32>
    %25 = tpu.matmul %23, %24, %cst_21 {dimension_numbers = #tpu.dot_dimension_numbers<[1], [0], [0], [1], [0, 0, 1, 1], [], []>} : vector<128x32xf32>, vector<32x32xf32>, vector<128x32xf32> -> vector<128x32xf32>
    %26 = tpu.reciprocal %25 {approx = true} : vector<128x32xf32> -> vector<128x32xf32>
    %27 = arith.mulf %23, %26 : vector<128x32xf32>
    %28 = arith.mulf %27, %11 : vector<128x32xf32>
    %c0_22 = arith.constant 0 : index
    %c0_23 = arith.constant 0 : index
    %29 = vector.load %arg8[%c0_22, %c0_23] : memref<32x32xf32, #tpu.memory_space<vmem>>, vector<32x32xf32>
    %cst_24 = arith.constant dense<0.000000e+00> : vector<128x32xf32>
    %30 = tpu.matmul %28, %29, %cst_24 {dimension_numbers = #tpu.dot_dimension_numbers<[1], [0], [0], [1], [0, 0, 1, 1], [], []>} : vector<128x32xf32>, vector<32x32xf32>, vector<128x32xf32> -> vector<128x32xf32>
    %31 = arith.divf %28, %30 : vector<128x32xf32>
    %32 = arith.mulf %31, %11 : vector<128x32xf32>
    %c0_25 = arith.constant 0 : index
    %c0_26 = arith.constant 0 : index
    %33 = vector.load %arg9[%c0_25, %c0_26] : memref<32x512xf32, #tpu.memory_space<vmem>>, vector<32x512xf32>
    %cst_27 = arith.constant dense<0.000000e+00> : vector<128x512xf32>
    %34 = tpu.matmul %32, %33, %cst_27 {dimension_numbers = #tpu.dot_dimension_numbers<[1], [0], [0], [1], [0, 0, 1, 1], [], []>} : vector<128x32xf32>, vector<32x512xf32>, vector<128x512xf32> -> vector<128x512xf32>
    %c0_28 = arith.constant 0 : index
    %c0_29 = arith.constant 0 : index
    %35 = vector.load %arg10[%c0_28, %c0_29] : memref<128x512xf32, #tpu.memory_space<vmem>>, vector<128x512xf32>
    %36 = arith.mulf %34, %35 : vector<128x512xf32>
    %37 = tpu.concatenate %2, %2, %2, %2 in 0 : vector<128x128xf32>, vector<128x128xf32>, vector<128x128xf32>, vector<128x128xf32> -> vector<512x128xf32>
    %c0_30 = arith.constant 0 : index
    %c0_31 = arith.constant 0 : index
    %38 = vector.load %arg11[%c0_30, %c0_31] : memref<512x128xf32, #tpu.memory_space<vmem>>, vector<512x128xf32>
    %39 = arith.mulf %37, %38 : vector<512x128xf32>
    %cst_32 = arith.constant dense<0.000000e+00> : vector<128x128xf32>
    %40 = tpu.matmul %36, %39, %cst_32 {dimension_numbers = #tpu.dot_dimension_numbers<[1], [0], [0], [1], [0, 0, 1, 1], [], []>} : vector<128x512xf32>, vector<512x128xf32>, vector<128x128xf32> -> vector<128x128xf32>
    %c0_33 = arith.constant 0 : index
    %c0_34 = arith.constant 0 : index
    %41 = vector.load %arg12[%c0_33, %c0_34] : memref<1x128xf32, #tpu.memory_space<vmem>>, vector<1x128xf32>
    %42 = vector.broadcast %41 : vector<1x128xf32> to vector<128x128xf32>
    %43 = arith.addf %40, %42 : vector<128x128xf32>
    %c0_35 = arith.constant 0 : index
    %c0_36 = arith.constant 0 : index
    %44 = vector.load %arg13[%c0_35, %c0_36] : memref<128x128xf32, #tpu.memory_space<vmem>>, vector<128x128xf32>
    tpu.vector_store %arg13[%c0_35, %c0_36], %43 {strides = array<i32>} : memref<128x128xf32, #tpu.memory_space<vmem>>, vector<128x128xf32>,
    return
  }
  func.func @transform_0(%arg0: i32) -> (i32, i32) {
    %c0_i32 = arith.constant 0 : i32
    %c0_i32_0 = arith.constant 0 : i32
    return %arg0, %c0_i32 : i32, i32
  }
  func.func @transform_1(%arg0: i32) -> (i32, i32) {
    %c0_i32 = arith.constant 0 : i32
    %c0_i32_0 = arith.constant 0 : i32
    return %arg0, %c0_i32 : i32, i32
  }
  func.func @transform_2(%arg0: i32) -> (i32, i32) {
    %c0_i32 = arith.constant 0 : i32
    %c0_i32_0 = arith.constant 0 : i32
    %c0_i32_1 = arith.constant 0 : i32
    return %c0_i32, %c0_i32_0 : i32, i32
  }
  func.func @transform_3(%arg0: i32) -> (i32, i32) {
    %c0_i32 = arith.constant 0 : i32
    %c0_i32_0 = arith.constant 0 : i32
    %c0_i32_1 = arith.constant 0 : i32
    return %c0_i32, %c0_i32_0 : i32, i32
  }
  func.func @transform_4(%arg0: i32) -> (i32, i32) {
    %c0_i32 = arith.constant 0 : i32
    %c0_i32_0 = arith.constant 0 : i32
    %c0_i32_1 = arith.constant 0 : i32
    return %c0_i32, %c0_i32_0 : i32, i32
  }
  func.func @transform_5(%arg0: i32) -> (i32, i32) {
    %c0_i32 = arith.constant 0 : i32
    %c0_i32_0 = arith.constant 0 : i32
    %c0_i32_1 = arith.constant 0 : i32
    return %c0_i32, %c0_i32_0 : i32, i32
  }
  func.func @transform_6(%arg0: i32) -> (i32, i32) {
    %c0_i32 = arith.constant 0 : i32
    %c0_i32_0 = arith.constant 0 : i32
    %c0_i32_1 = arith.constant 0 : i32
    return %c0_i32, %c0_i32_0 : i32, i32
  }
  func.func @transform_7(%arg0: i32) -> (i32, i32) {
    %c0_i32 = arith.constant 0 : i32
    %c0_i32_0 = arith.constant 0 : i32
    %c0_i32_1 = arith.constant 0 : i32
    return %c0_i32, %c0_i32_0 : i32, i32
  }
  func.func @transform_8(%arg0: i32) -> (i32, i32) {
    %c0_i32 = arith.constant 0 : i32
    %c0_i32_0 = arith.constant 0 : i32
    %c0_i32_1 = arith.constant 0 : i32
    return %c0_i32, %c0_i32_0 : i32, i32
  }
  func.func @transform_9(%arg0: i32) -> (i32, i32) {
    %c0_i32 = arith.constant 0 : i32
    %c0_i32_0 = arith.constant 0 : i32
    %c0_i32_1 = arith.constant 0 : i32
    return %c0_i32, %c0_i32_0 : i32, i32
  }
  func.func @transform_10(%arg0: i32) -> (i32, i32) {
    %c0_i32 = arith.constant 0 : i32
    %c0_i32_0 = arith.constant 0 : i32
    %c0_i32_1 = arith.constant 0 : i32
    return %c0_i32, %c0_i32_0 : i32, i32
  }
  func.func @transform_11(%arg0: i32) -> (i32, i32) {
    %c0_i32 = arith.constant 0 : i32
    %c0_i32_0 = arith.constant 0 : i32
    %c0_i32_1 = arith.constant 0 : i32
    return %c0_i32, %c0_i32_0 : i32, i32
  }
  func.func @transform_12(%arg0: i32) -> (i32, i32) {
    %c0_i32 = arith.constant 0 : i32
    %c0_i32_0 = arith.constant 0 : i32
    return %arg0, %c0_i32 : i32, i32
  }
}

</mosaic_0001>

<bundles_post_ra>
// kernel: tpu_custom_call.1
= control target key start
LH: loop header
LB: loop body
LE: loop exit
PB: predicated region body
PF: predicated region fallthrough
CT: control target
= control target key end

     0   :  { %17 = vsyncpa [#allocation3], 0  ;;  %s3548_s0 = inlined_call_operand.vmem [shape: f32[128,32], index: 0, kind: input, shape index: {}]   ;;  %s3549_s1 = inlined_call_operand.vmem [shape: f32[128,32], index: 1, kind: input, shape index: {}]   ;;  %s3550_s2 = inlined_call_operand.vmem [shape: f32[32,128], index: 2, kind: input, shape index: {}]   ;;  %s3551_s3 = inlined_call_operand.vmem [shape: f32[128,32], index: 3, kind: input, shape index: {}]   ;;  %s3552_s4 = inlined_call_operand.vmem [shape: f32[128,32], index: 4, kind: input, shape index: {}]   ;;  %s3553_s5 = inlined_call_operand.vmem [shape: f32[128,32], index: 5, kind: input, shape index: {}]   ;;  %s3554_s6 = inlined_call_operand.vmem [shape: f32[128,128], index: 6, kind: input, shape index: {}]   ;;  %s3555_s7 = inlined_call_operand.vmem [shape: f32[32,32], index: 7, kind: input, shape index: {}]   ;;  %s3556_s8 = inlined_call_operand.vmem [shape: f32[32,512], index: 8, kind: input, shape index: {}]   ;;  %s3557_s9 = inlined_call_operand.hbm [shape: f32[128,512], index: 9, kind: input, shape index: {}]   ;;  %s3558_s10 = inlined_call_operand.hbm [shape: f32[512,128], index: 10, kind: input, shape index: {}]   ;;  %s3559_s11 = inlined_call_operand.vmem [shape: f32[1,128], index: 11, kind: input, shape index: {}]   ;;  %s3560_s12 = inlined_call_operand.hbm [shape: f32[128,128], index: 12, kind: output, shape index: {}]  }
   0x1   :  { %18 = vsyncpa [#allocation6], 0 }
   0x2   :  { %19 = vsyncpa [#allocation4], 0  ;;  %s42_s23 = sshll.u32 %s3557_s9, 4  ;;  %s2410_s24 = smov [#allocation2]   ;;  %s43_s23 = int_to_ptr.hbm [resolvable:$true] %s42_s23 }
   0x3   :  { %s44_s25 = sshll.u32 %s2410_s24, 4  ;;  %s55_s28 = sshll.u32 %s3558_s10, 4  ;;  %s45_s25 = int_to_ptr.vmem [resolvable:$true] %s44_s25  ;;  %s56_s28 = int_to_ptr.hbm [resolvable:$true] %s55_s28 }
   0x4   :  { %s2411_s29 = smov 512   ;;  %s2412_s30 = smov 32  }
   0x5   :  { %50 = dma.hbm_to_vmem [thread:$0]  %s43_s23, 8192, %s45_s25, [#allocation3], %s2411_s29, %s2411_s29, %s2412_s30  }
   0x6   :  { %s2413_s13 = smov [#allocation5]   ;;  %s2414_s15 = smov 128  }
   0x7   :  { %s57_s14 = sshll.u32 %s2413_s13, 4  ;;  %s2415_s16 = smov 8   ;;  %s58_s14 = int_to_ptr.vmem [resolvable:$true] %s57_s14 }
   0x8   :  { %63 = dma.hbm_to_vmem [thread:$0]  %s56_s28, 8192, %s58_s14, [#allocation6], %s2414_s15, %s2414_s15, %s2415_s16  }
   0x9   :  { %2404 = dma.done.wait [#allocation3], 8192  }
   0xa   :  { %2405 = vsyncadd [#allocation3], 4294959104 }
   0xb   :  { %2406 = dma.done.wait [#allocation6], 8192  }
   0xc   :  { %2407 = vsyncadd [#allocation6], 4294959104  ;;  %v93_v0 = vld [vmem:[%s3550_s2 + $0x18] sm:$0xff]  ;;  %v92_v1 = vld [vmem:[%s3550_s2 + $0x10] sm:$0xff]  ;;  %vm94_vm0 = vcmask 261120  }
   0xd   :  { %155 = vmatpush.msra.mxu0 %v93_v0  ;;  %2185 = vmatpush.msra.mxu3 %v93_v0  ;;  %v91_v2 = vld [vmem:[%s3550_s2 + $0x8] sm:$0xff]  ;;  %v90_v3 = vld [vmem:[%s3550_s2] sm:$0xff]  ;;  %v76_v6 = vld [vmem:[%s3548_s0 + $0x10] sm:$0xff] }
   0xe   :  { %v74_v4 = vld [vmem:[%s3548_s0] sm:$0xff]  ;;  %v75_v5 = vld [vmem:[%s3548_s0 + $0x8] sm:$0xff]  ;;  %v77_v7 = vld [vmem:[%s3548_s0 + $0x18] sm:$0xff] }
   0xf   :  { %156 = vmatpush.msra.mxu0 %v92_v1  ;;  %2186 = vmatpush.msra.mxu3 %v92_v1  ;;  %v78_v8 = vld [vmem:[%s3548_s0 + $0x20] sm:$0xff]  ;;  %v79_v9 = vld [vmem:[%s3548_s0 + $0x28] sm:$0xff]  ;;  %v84_v10 = vld [vmem:[%s3548_s0 + $0x50] sm:$0xff] }
  0x10   :  { %v239_v11 = vld [vmem:[%s3552_s4 + $0x78] sm:$0xff]  ;;  %v238_v13 = vld [vmem:[%s3552_s4 + $0x70] sm:$0xff]  ;;  %v237_v15 = vld [vmem:[%s3552_s4 + $0x68] sm:$0xff] }
  0x11   :  { %157 = vmatpush.msra.mxu0 %v91_v2  ;;  %2187 = vmatpush.msra.mxu3 %v91_v2  ;;  %v223_v12 = vld [vmem:[%s3551_s3 + $0x78] sm:$0xff]  ;;  %v222_v14 = vld [vmem:[%s3551_s3 + $0x70] sm:$0xff]  ;;  %v221_v16 = vld [vmem:[%s3551_s3 + $0x68] sm:$0xff] }
  0x12   :  { %240 = vmatpush.msra.mxu1 %v239_v11  ;;  %2189 = vmatpush.msra.mxu2 %v239_v11  ;;  %v80_v17 = vld [vmem:[%s3548_s0 + $0x30] sm:$0xff]  ;;  %v236_v18 = vld [vmem:[%s3552_s4 + $0x60] sm:$0xff]  ;;  %v85_v19 = vld [vmem:[%s3548_s0 + $0x58] sm:$0xff] }
  0x13   :  { %158 = vmatpush.msra.mxu0 %v90_v3  ;;  %2188 = vmatpush.msra.mxu3 %v90_v3  ;;  %v220_v20 = vld [vmem:[%s3551_s3 + $0x60] sm:$0xff]  ;;  %v235_v21 = vld [vmem:[%s3552_s4 + $0x58] sm:$0xff]  ;;  %v234_v23 = vld [vmem:[%s3552_s4 + $0x50] sm:$0xff] }
  0x14   :  { %2073 = vmatmul.msk.f32.vlgmr.msra.gmra.mxu0 %vm94_vm0, %v74_v4  ;;  %2083 = vmatmul.msk.f32.vlgmr.msra.gmra.mxu3 %vm94_vm0, %v84_v10  ;;  %v219_v22 = vld [vmem:[%s3551_s3 + $0x58] sm:$0xff]  ;;  %v218_v24 = vld [vmem:[%s3551_s3 + $0x50] sm:$0xff]  ;;  %v233_v25 = vld [vmem:[%s3552_s4 + $0x48] sm:$0xff] }
  0x15   :  { %434 = vmatpush.msrb.mxu3 %v223_v12  ;;  %241 = vmatpush.msra.mxu1 %v238_v13  ;;  %v81_v26 = vld [vmem:[%s3548_s0 + $0x38] sm:$0xff]  ;;  %v217_v27 = vld [vmem:[%s3551_s3 + $0x48] sm:$0xff]  ;;  %v86_v28 = vld [vmem:[%s3548_s0 + $0x60] sm:$0xff] }
  0x16   :  { %2190 = vmatpush.msra.mxu2 %v238_v13  ;;  %v232_v29 = vld [vmem:[%s3552_s4 + $0x40] sm:$0xff]  ;;  %v231_v31 = vld [vmem:[%s3552_s4 + $0x38] sm:$0xff]  ;;  %v230_v33 = vld [vmem:[%s3552_s4 + $0x30] sm:$0xff] }
  0x17   :  { %435 = vmatpush.msrb.mxu3 %v222_v14  ;;  %242 = vmatpush.msra.mxu1 %v237_v15  ;;  %v216_v30 = vld [vmem:[%s3551_s3 + $0x40] sm:$0xff]  ;;  %v215_v32 = vld [vmem:[%s3551_s3 + $0x38] sm:$0xff]  ;;  %v214_v34 = vld [vmem:[%s3551_s3 + $0x30] sm:$0xff] }
  0x18   :  { %2191 = vmatpush.msra.mxu2 %v237_v15  ;;  %v229_v35 = vld [vmem:[%s3552_s4 + $0x28] sm:$0xff]  ;;  %v82_v36 = vld [vmem:[%s3548_s0 + $0x40] sm:$0xff]  ;;  %v227_v41 = vld [vmem:[%s3552_s4 + $0x18] sm:$0xff] }
  0x19   :  { %436 = vmatpush.msrb.mxu3 %v221_v16  ;;  %243 = vmatpush.msra.mxu1 %v236_v18  ;;  %v213_v37 = vld [vmem:[%s3551_s3 + $0x28] sm:$0xff]  ;;  %v228_v39 = vld [vmem:[%s3552_s4 + $0x20] sm:$0xff]  ;;  %v211_v42 = vld [vmem:[%s3551_s3 + $0x18] sm:$0xff] }
  0x1a   :  { %2192 = vmatpush.msra.mxu2 %v236_v18  ;;  %v87_v38 = vld [vmem:[%s3548_s0 + $0x68] sm:$0xff]  ;;  %v212_v40 = vld [vmem:[%s3551_s3 + $0x20] sm:$0xff]  ;;  %v226_v43 = vld [vmem:[%s3552_s4 + $0x10] sm:$0xff] }
  0x1b   :  { %437 = vmatpush.msrb.mxu3 %v220_v20  ;;  %244 = vmatpush.msra.mxu1 %v235_v21  ;;  %v210_v44 = vld [vmem:[%s3551_s3 + $0x10] sm:$0xff]  ;;  %v225_v45 = vld [vmem:[%s3552_s4 + $0x8] sm:$0xff]  ;;  %v89_v49 = vld [vmem:[%s3548_s0 + $0x78] sm:$0xff] }
  0x1c   :  { %2074 = vmatmul.msk.f32.gmra.mxu0 %vm94_vm0, %v75_v5  ;;  %2084 = vmatmul.msk.f32.gmra.mxu3 %vm94_vm0, %v85_v19  ;;  %v83_v46 = vld [vmem:[%s3548_s0 + $0x48] sm:$0xff]  ;;  %v88_v48 = vld [vmem:[%s3548_s0 + $0x70] sm:$0xff]  ;;  %v224_v50 = vld [vmem:[%s3552_s4] sm:$0xff]  ;;  %s2059_s4 = sshll.u32 %s3560_s12, 4  ;;  %s2060_s4 = int_to_ptr.hbm [resolvable:$true] %s2059_s4 }
  0x1d   :  { %2193 = vmatpush.msra.mxu2 %v235_v21  ;;  %438 = vmatpush.msrb.mxu3 %v219_v22  ;;  %v209_v47 = vld [vmem:[%s3551_s3 + $0x8] sm:$0xff]  ;;  %v208_v51 = vld [vmem:[%s3551_s3] sm:$0xff]  ;;  %v319_v19 = vld [vmem:[%s3553_s5 + $0x70] sm:$0xff] }
  0x1e   :  { %245 = vmatpush.msra.mxu1 %v234_v23  ;;  %v318_v21 = vld [vmem:[%s3553_s5 + $0x68] sm:$0xff] }
  0x1f   :  { %2194 = vmatpush.msra.mxu2 %v234_v23  ;;  %439 = vmatpush.msrb.mxu3 %v218_v24  ;;  %v317_v24 = vld [vmem:[%s3553_s5 + $0x60] sm:$0xff] }
  0x20   :  { %246 = vmatpush.msra.mxu1 %v233_v25 }
  0x21   :  { %2195 = vmatpush.msra.mxu2 %v233_v25  ;;  %440 = vmatpush.msrb.mxu3 %v217_v27 }
  0x22   :  { %247 = vmatpush.msra.mxu1 %v232_v29 }
  0x23   :  { %441 = vmatpush.msrb.mxu3 %v216_v30  ;;  %2196 = vmatpush.msra.mxu2 %v232_v29  ;;  %v314_v30 = vld [vmem:[%s3553_s5 + $0x48] sm:$0xff] }
  0x24   :  { %2075 = vmatmul.msk.f32.gmra.mxu0 %vm94_vm0, %v76_v6  ;;  %2085 = vmatmul.msk.f32.gmra.mxu3 %vm94_vm0, %v86_v28  ;;  %v315_v28 = vld [vmem:[%s3553_s5 + $0x50] sm:$0xff] }
  0x25   :  { %248 = vmatpush.msra.mxu1 %v231_v31  ;;  %442 = vmatpush.msrb.mxu3 %v215_v32  ;;  %v313_v32 = vld [vmem:[%s3553_s5 + $0x40] sm:$0xff] }
  0x26   :  { %2197 = vmatpush.msra.mxu2 %v231_v31 }
  0x27   :  { %249 = vmatpush.msra.mxu1 %v230_v33  ;;  %443 = vmatpush.msrb.mxu3 %v214_v34 }
  0x28   :  { %2198 = vmatpush.msra.mxu2 %v230_v33 }
  0x29   :  { %250 = vmatpush.msra.mxu1 %v229_v35  ;;  %444 = vmatpush.msrb.mxu3 %v213_v37  ;;  %v311_v37 = vld [vmem:[%s3553_s5 + $0x30] sm:$0xff] }
  0x2a   :  { %2199 = vmatpush.msra.mxu2 %v229_v35  ;;  %v312_v35 = vld [vmem:[%s3553_s5 + $0x38] sm:$0xff] }
  0x2b   :  { %251 = vmatpush.msra.mxu1 %v228_v39  ;;  %445 = vmatpush.msrb.mxu3 %v212_v40 }
  0x2c   :  { %2076 = vmatmul.msk.f32.gmra.mxu0 %vm94_vm0, %v77_v7  ;;  %2086 = vmatmul.msk.f32.gmra.mxu3 %vm94_vm0, %v87_v38 }
  0x2d   :  { %252 = vmatpush.msra.mxu1 %v227_v41  ;;  %446 = vmatpush.msrb.mxu3 %v211_v42 }
  0x2e   :  { %2200 = vmatpush.msra.mxu2 %v228_v39  ;;  %v310_v39 = vld [vmem:[%s3553_s5 + $0x28] sm:$0xff] }
  0x2f   :  { %253 = vmatpush.msra.mxu1 %v226_v43  ;;  %447 = vmatpush.msrb.mxu3 %v210_v44 }
  0x30   :  { %2201 = vmatpush.msra.mxu2 %v227_v41  ;;  %v309_v41 = vld [vmem:[%s3553_s5 + $0x20] sm:$0xff] }
  0x31   :  { %254 = vmatpush.msra.mxu1 %v225_v45  ;;  %448 = vmatpush.msrb.mxu3 %v209_v47  ;;  %v306_v47 = vld [vmem:[%s3553_s5 + $0x8] sm:$0xff] }
  0x32   :  { %2202 = vmatpush.msra.mxu2 %v226_v43  ;;  %v308_v43 = vld [vmem:[%s3553_s5 + $0x18] sm:$0xff] }
  0x33   :  { %255 = vmatpush.msra.mxu1 %v224_v50  ;;  %449 = vmatpush.msrb.mxu3 %v208_v51 }
  0x34   :  { %2077 = vmatmul.msk.f32.gmra.mxu0 %vm94_vm0, %v78_v8  ;;  %2087 = vmatmul.msk.f32.gmra.mxu3 %vm94_vm0, %v88_v48 }
  0x35   :  { %2203 = vmatpush.msra.mxu2 %v225_v45  ;;  %v307_v45 = vld [vmem:[%s3553_s5 + $0x10] sm:$0xff] }
  0x37   :  { %2204 = vmatpush.msra.mxu2 %v224_v50 }
  0x3c   :  { %2078 = vmatmul.msk.f32.gmra.mxu0 %vm94_vm0, %v79_v9  ;;  %2088 = vmatmul.msk.f32.gmra.mxu3 %vm94_vm0, %v89_v49  ;;  %v305_v49 = vld [vmem:[%s3553_s5] sm:$0xff] }
  0x44   :  { %2079 = vmatmul.msk.f32.gmra.mxu0 %vm94_vm0, %v80_v17  ;;  %v320_v17 = vld [vmem:[%s3553_s5 + $0x78] sm:$0xff] }
  0x4c   :  { %2080 = vmatmul.msk.f32.gmra.mxu0 %vm94_vm0, %v81_v26  ;;  %v316_v26 = vld [vmem:[%s3553_s5 + $0x58] sm:$0xff] }
  0x54   :  { %2081 = vmatmul.msk.f32.gmra.mxu0 %vm94_vm0, %v82_v36 }
  0x5c   :  { %2082 = vmatmul.msk.f32.gmra.mxu0 %vm94_vm0, %v83_v46 }
  0x91   :  { %v2663_v52 = vpop.f32.mrf.mxu0 }
  0x92   :  { %256 = vmatmul.f32.vlgmr.msra.gmra.mxu1 %v2663_v52  ;;  %450 = vmatmul.f32.vlgmr.msrb.gmra.mxu3 %v2663_v52 }
  0x97   :  { %v2699_v61 = vpop.f32.mrf.mxu3 }
  0x99   :  { %v2667_v53 = vpop.f32.mrf.mxu0 }
  0x9a   :  { %259 = vmatmul.f32.gmra.mxu1 %v2667_v53  ;;  %453 = vmatmul.f32.gmra.mxu3 %v2667_v53 }
  0x9f   :  { %v2705_v63 = vpop.f32.mrf.mxu3 }
  0xa1   :  { %v2671_v54 = vpop.f32.mrf.mxu0 }
  0xa2   :  { %262 = vmatmul.f32.gmra.mxu1 %v2671_v54  ;;  %456 = vmatmul.f32.gmra.mxu3 %v2671_v54 }
  0xa7   :  { %v2709_v0 = vpop.f32.mrf.mxu3 }
  0xa9   :  { %v2675_v55 = vpop.f32.mrf.mxu0 }
  0xaa   :  { %265 = vmatmul.f32.gmra.mxu1 %v2675_v55  ;;  %459 = vmatmul.f32.gmra.mxu3 %v2675_v55 }
  0xaf   :  { %v2715_v1 = vpop.f32.mrf.mxu3 }
  0xb1   :  { %v2679_v56 = vpop.f32.mrf.mxu0 }
  0xb2   :  { %268 = vmatmul.f32.gmra.mxu1 %v2679_v56  ;;  %462 = vmatmul.f32.gmra.mxu3 %v2679_v56 }
  0xb7   :  { %v2719_v2 = vpop.f32.mrf.mxu3 }
  0xb9   :  { %v2683_v57 = vpop.f32.mrf.mxu0 }
  0xba   :  { %271 = vmatmul.f32.gmra.mxu1 %v2683_v57  ;;  %465 = vmatmul.f32.gmra.mxu3 %v2683_v57 }
  0xbf   :  { %v2723_v3 = vpop.f32.mrf.mxu3 }
  0xc1   :  { %v2687_v58 = vpop.f32.mrf.mxu0 }
  0xc2   :  { %274 = vmatmul.f32.gmra.mxu1 %v2687_v58  ;;  %468 = vmatmul.f32.gmra.mxu3 %v2687_v58 }
  0xc9   :  { %v2691_v59 = vpop.f32.mrf.mxu0 }
  0xca   :  { %277 = vmatmul.f32.gmra.mxu1 %v2691_v59  ;;  %471 = vmatmul.f32.gmra.mxu3 %v2691_v59 }
  0xd1   :  { %v2695_v60 = vpop.f32.mrf.mxu0 }
  0xd2   :  { %280 = vmatmul.f32.vlgmr.msra.gmra.mxu2 %v2695_v60  ;;  %474 = vmatmul.f32.gmra.mxu3 %v2695_v60 }
  0xd9   :  { %v2701_v62 = vpop.f32.mrf.mxu0 }
  0xda   :  { %283 = vmatmul.f32.gmra.mxu2 %v2701_v62  ;;  %477 = vmatmul.f32.gmra.mxu3 %v2701_v62 }
  0xe2   :  { %286 = vmatmul.f32.gmra.mxu2 %v2699_v61  ;;  %480 = vmatmul.f32.gmra.mxu3 %v2699_v61 }
  0xea   :  { %289 = vmatmul.f32.gmra.mxu2 %v2705_v63  ;;  %483 = vmatmul.f32.gmra.mxu3 %v2705_v63 }
  0xf2   :  { %292 = vmatmul.f32.gmra.mxu2 %v2709_v0  ;;  %486 = vmatmul.f32.gmra.mxu3 %v2709_v0 }
  0xfa   :  { %295 = vmatmul.f32.gmra.mxu2 %v2715_v1  ;;  %489 = vmatmul.f32.gmra.mxu3 %v2715_v1 }
 0x102   :  { %298 = vmatmul.f32.gmra.mxu2 %v2719_v2  ;;  %492 = vmatmul.f32.gmra.mxu3 %v2719_v2 }
 0x10a   :  { %301 = vmatmul.f32.gmra.mxu2 %v2723_v3  ;;  %495 = vmatmul.f32.gmra.mxu3 %v2723_v3 }
 0x10f   :  { %v257_v4 = vpop.f32.mrf.mxu1 }
 0x110   :  { %v321_v51 = vmul.f32 %v305_v49, %v257_v4  ;;  %v2792_v4 = vld [vmem:[%s3556_s8 + $0x20] sm:$0xff]  ;;  %v346_v49 = vld [vmem:[%s3554_s6 + $0x48] sm:$0xff] }
 0x117   :  { %v260_v7 = vpop.f32.mrf.mxu1 }
 0x118   :  { %v322_v50 = vmul.f32 %v306_v47, %v260_v7  ;;  %v1660_v7 = vld [vmem:[#allocation5 + $0x78] sm:$0xff] }
 0x119   :  { %v344_v47 = vld [vmem:[%s3554_s6 + $0x38] sm:$0xff] }
 0x11f   :  { %v263_v9 = vpop.f32.mrf.mxu1 }
 0x120   :  { %v323_v48 = vmul.f32 %v307_v45, %v263_v9  ;;  %v2798_v9 = vld [vmem:[%s3556_s8] sm:$0xff]  ;;  %v342_v45 = vld [vmem:[%s3554_s6 + $0x28] sm:$0xff] }
 0x127   :  { %v266_v11 = vpop.f32.mrf.mxu1 }
 0x128   :  { %v324_v46 = vmul.f32 %v308_v43, %v266_v11  ;;  %v1724_v11 = vmul.f32 %v1660_v7, %v2723_v3  ;;  %v451_v7 = vpop.f32.mrf.mxu3 }
 0x12f   :  { %v269_v13 = vpop.f32.mrf.mxu1 }
 0x130   :  { %v325_v44 = vmul.f32 %v309_v41, %v269_v13  ;;  %v1658_v13 = vld [vmem:[#allocation5 + $0x68] sm:$0xff] }
 0x137   :  { %v272_v16 = vpop.f32.mrf.mxu1 }
 0x138   :  { %v326_v42 = vmul.f32 %v310_v39, %v272_v16  ;;  %v1722_v16 = vmul.f32 %v1658_v13, %v2715_v1  ;;  %v341_v39 = vld [vmem:[%s3554_s6 + $0x20] sm:$0xff]  ;;  %v352_v13 = vld [vmem:[%s3554_s6 + $0x78] sm:$0xff] }
 0x13f   :  { %v275_v23 = vpop.f32.mrf.mxu1 }
 0x140   :  { %v327_v40 = vmul.f32 %v311_v37, %v275_v23  ;;  %v1647_v37 = vld [vmem:[#allocation5 + $0x10] sm:$0xff] }
 0x141   :  { %v1711_v41 = vmul.f32 %v1647_v37, %v2671_v54 }
 0x147   :  { %v278_v34 = vpop.f32.mrf.mxu1 }
 0x148   :  { %v328_v38 = vmul.f32 %v312_v35, %v278_v34  ;;  %v1648_v35 = vld [vmem:[#allocation5 + $0x18] sm:$0xff] }
 0x155   :  { %v281_v5 = vpop.f32.mrf.mxu2 }
 0x156   :  { %v329_v36 = vmul.f32 %v313_v32, %v281_v5  ;;  %v337_v5 = vld [vmem:[%s3554_s6] sm:$0xff] }
 0x15d   :  { %v284_v6 = vpop.f32.mrf.mxu2 }
 0x15e   :  { %v330_v33 = vmul.f32 %v314_v30, %v284_v6  ;;  %v2781_v6 = vld [vmem:[%s3556_s8 + $0x60] sm:$0xff]  ;;  %v340_v30 = vld [vmem:[%s3554_s6 + $0x18] sm:$0xff] }
 0x165   :  { %v287_v8 = vpop.f32.mrf.mxu2 }
 0x166   :  { %v331_v31 = vmul.f32 %v315_v28, %v287_v8  ;;  %v2786_v8 = vld [vmem:[%s3556_s8 + $0x40] sm:$0xff]  ;;  %v1651_v28 = vld [vmem:[#allocation5 + $0x30] sm:$0xff] }
 0x167   :  { %v1715_v32 = vmul.f32 %v1651_v28, %v2687_v58 }
 0x16d   :  { %v290_v10 = vpop.f32.mrf.mxu2 }
 0x16e   :  { %v332_v29 = vmul.f32 %v316_v26, %v290_v10  ;;  %v1659_v10 = vld [vmem:[#allocation5 + $0x70] sm:$0xff]  ;;  %v1652_v26 = vld [vmem:[#allocation5 + $0x38] sm:$0xff] }
 0x175   :  { %v293_v12 = vpop.f32.mrf.mxu2 }
 0x176   :  { %v333_v27 = vmul.f32 %v317_v24, %v293_v12  ;;  %v338_v12 = vld [vmem:[%s3554_s6 + $0x8] sm:$0xff]  ;;  %v1653_v24 = vld [vmem:[#allocation5 + $0x40] sm:$0xff] }
 0x17d   :  { %v296_v14 = vpop.f32.mrf.mxu2 }
 0x17e   :  { %v334_v25 = vmul.f32 %v318_v21, %v296_v14  ;;  %v1723_v14 = vmul.f32 %v1659_v10, %v2719_v2  ;;  %v339_v21 = vld [vmem:[%s3554_s6 + $0x10] sm:$0xff]  ;;  %v350_v10 = vld [vmem:[%s3554_s6 + $0x68] sm:$0xff] }
 0x185   :  { %v299_v15 = vpop.f32.mrf.mxu2 }
 0x186   :  { %v335_v22 = vmul.f32 %v319_v19, %v299_v15  ;;  %v1657_v15 = vld [vmem:[#allocation5 + $0x60] sm:$0xff]  ;;  %v1655_v19 = vld [vmem:[#allocation5 + $0x50] sm:$0xff] }
 0x187   :  { %v1719_v23 = vmul.f32 %v1655_v19, %v2699_v61  ;;  %v2866_v19 = vld [vmem:[%s3549_s1] sm:$0xff] }
 0x18d   :  { %v302_v18 = vpop.f32.mrf.mxu2 }
 0x18e   :  { %v336_v20 = vmul.f32 %v320_v17, %v302_v18  ;;  %v1656_v17 = vld [vmem:[#allocation5 + $0x58] sm:$0xff]  ;;  %v1721_v18 = vmul.f32 %v1657_v15, %v2709_v0 }
 0x190   :  { %353 = vmatpush.msrb.mxu2 %v336_v20  ;;  %v1720_v20 = vmul.f32 %v1656_v17, %v2705_v63 }
 0x192   :  { %354 = vmatpush.msrb.mxu2 %v335_v22  ;;  %v1654_v22 = vld [vmem:[#allocation5 + $0x48] sm:$0xff] }
 0x194   :  { %355 = vmatpush.msrb.mxu2 %v334_v25  ;;  %v1718_v25 = vmul.f32 %v1654_v22, %v2701_v62 }
 0x196   :  { %356 = vmatpush.msrb.mxu2 %v333_v27  ;;  %v1717_v27 = vmul.f32 %v1653_v24, %v2695_v60 }
 0x198   :  { %357 = vmatpush.msrb.mxu2 %v332_v29  ;;  %v1716_v29 = vmul.f32 %v1652_v26, %v2691_v59 }
 0x19a   :  { %358 = vmatpush.msrb.mxu2 %v331_v31  ;;  %v1650_v31 = vld [vmem:[#allocation5 + $0x28] sm:$0xff] }
 0x19b   :  { %v1714_v34 = vmul.f32 %v1650_v31, %v2683_v57 }
 0x19c   :  { %359 = vmatpush.msrb.mxu2 %v330_v33  ;;  %v1649_v33 = vld [vmem:[#allocation5 + $0x20] sm:$0xff] }
 0x19e   :  { %360 = vmatpush.msrb.mxu2 %v329_v36  ;;  %v1713_v36 = vmul.f32 %v1649_v33, %v2679_v56 }
 0x1a0   :  { %361 = vmatpush.msrb.mxu2 %v328_v38  ;;  %v1712_v38 = vmul.f32 %v1648_v35, %v2675_v55 }
 0x1a2   :  { %362 = vmatpush.msrb.mxu2 %v327_v40  ;;  %v1646_v40 = vld [vmem:[#allocation5 + $0x8] sm:$0xff] }
 0x1a3   :  { %v1710_v43 = vmul.f32 %v1646_v40, %v2667_v53 }
 0x1a4   :  { %363 = vmatpush.msrb.mxu2 %v326_v42  ;;  %v1645_v42 = vld [vmem:[#allocation5] sm:$0xff] }
 0x1a6   :  { %364 = vmatpush.msrb.mxu2 %v325_v44  ;;  %v1709_v44 = vmul.f32 %v1645_v42, %v2663_v52  ;;  %v2896_v42 = vld [vmem:[%s3549_s1 + $0x18] sm:$0xff] }
 0x1a8   :  { %365 = vmatpush.msrb.mxu2 %v324_v46  ;;  %v343_v46 = vld [vmem:[%s3554_s6 + $0x30] sm:$0xff] }
 0x1aa   :  { %366 = vmatpush.msrb.mxu2 %v323_v48  ;;  %v345_v48 = vld [vmem:[%s3554_s6 + $0x40] sm:$0xff] }
 0x1ac   :  { %367 = vmatpush.msrb.mxu2 %v322_v50  ;;  %v347_v50 = vld [vmem:[%s3554_s6 + $0x50] sm:$0xff] }
 0x1ae   :  { %368 = vmatpush.msrb.mxu2 %v321_v51  ;;  %v348_v51 = vld [vmem:[%s3554_s6 + $0x58] sm:$0xff] }
 0x1af   :  { %369 = vmatmul.f32.vlgmr.msrb.gmra.mxu2 %v337_v5  ;;  %v349_v5 = vld [vmem:[%s3554_s6 + $0x60] sm:$0xff] }
 0x1b0   :  { %1269 = vmatpush.msra.mxu2 %v2781_v6 }
 0x1b2   :  { %1270 = vmatpush.msra.mxu2 %v2786_v8 }
 0x1b4   :  { %1271 = vmatpush.msra.mxu2 %v2792_v4 }
 0x1b6   :  { %1272 = vmatpush.msra.mxu2 %v2798_v9 }
 0x1b7   :  { %372 = vmatmul.f32.gmra.mxu2 %v338_v12  ;;  %v454_v12 = vpop.f32.mrf.mxu3 }
 0x1b8   :  { %1777 = vmatpush.msrb.mxu2 %v1724_v11  ;;  %v351_v11 = vld [vmem:[%s3554_s6 + $0x70] sm:$0xff] }
 0x1ba   :  { %1778 = vmatpush.msrb.mxu2 %v1723_v14 }
 0x1bc   :  { %1779 = vmatpush.msrb.mxu2 %v1722_v16 }
 0x1be   :  { %1780 = vmatpush.msrb.mxu2 %v1721_v18 }
 0x1bf   :  { %375 = vmatmul.f32.gmra.mxu2 %v339_v21  ;;  %v457_v14 = vpop.f32.mrf.mxu3 }
 0x1c0   :  { %1781 = vmatpush.msrb.mxu2 %v1720_v20 }
 0x1c2   :  { %1782 = vmatpush.msrb.mxu2 %v1719_v23 }
 0x1c4   :  { %1783 = vmatpush.msrb.mxu2 %v1718_v25 }
 0x1c6   :  { %1784 = vmatpush.msrb.mxu2 %v1717_v27  ;;  %v2876_v27 = vld [vmem:[%s3549_s1 + $0x8] sm:$0xff] }
 0x1c7   :  { %378 = vmatmul.f32.gmra.mxu2 %v340_v30  ;;  %v460_v16 = vpop.f32.mrf.mxu3 }
 0x1c8   :  { %1785 = vmatpush.msrb.mxu2 %v1716_v29 }
 0x1ca   :  { %1786 = vmatpush.msrb.mxu2 %v1715_v32 }
 0x1cc   :  { %1787 = vmatpush.msrb.mxu2 %v1714_v34  ;;  %v2886_v34 = vld [vmem:[%s3549_s1 + $0x10] sm:$0xff] }
 0x1ce   :  { %1788 = vmatpush.msrb.mxu2 %v1713_v36 }
 0x1cf   :  { %381 = vmatmul.f32.gmra.mxu2 %v341_v39  ;;  %v463_v25 = vpop.f32.mrf.mxu3 }
 0x1d0   :  { %1789 = vmatpush.msrb.mxu2 %v1712_v38 }
 0x1d2   :  { %1790 = vmatpush.msrb.mxu2 %v1711_v41 }
 0x1d4   :  { %1791 = vmatpush.msrb.mxu2 %v1710_v43 }
 0x1d6   :  { %1792 = vmatpush.msrb.mxu2 %v1709_v44 }
 0x1d7   :  { %384 = vmatmul.f32.gmra.mxu2 %v342_v45  ;;  %v466_v35 = vpop.f32.mrf.mxu3 }
 0x1df   :  { %387 = vmatmul.f32.gmra.mxu2 %v343_v46  ;;  %v469_v44 = vpop.f32.mrf.mxu3 }
 0x1e7   :  { %390 = vmatmul.f32.gmra.mxu2 %v344_v47 }
 0x1ef   :  { %393 = vmatmul.f32.gmra.mxu2 %v345_v48 }
 0x1f7   :  { %396 = vmatmul.f32.gmra.mxu2 %v346_v49 }
 0x1ff   :  { %399 = vmatmul.f32.gmra.mxu2 %v347_v50  ;;  %v2906_v50 = vld [vmem:[%s3549_s1 + $0x20] sm:$0xff] }
 0x207   :  { %402 = vmatmul.f32.gmra.mxu2 %v348_v51 }
 0x20f   :  { %405 = vmatmul.f32.gmra.mxu2 %v349_v5 }
 0x217   :  { %408 = vmatmul.f32.gmra.mxu2 %v350_v10 }
 0x21f   :  { %411 = vmatmul.f32.gmra.mxu2 %v351_v11 }
 0x227   :  { %414 = vmatmul.f32.gmra.mxu2 %v352_v13 }
 0x232   :  { %v370_v15 = vpop.f32.mrf.mxu2 }
 0x233   :  { %v452_v17 = vadd.f32 %v451_v7, %v370_v15  ;;  %v472_v7 = vpop.f32.mrf.mxu3 }
 0x235   :  { %v515_v18 = vmul.f32 0.2, %v452_v17  ;;  %vm499_vm1 = vcmp.ge.f32.partialorder %v452_v17, 0.0 }
 0x237   :  { %v531_v20 = vsel %vm499_vm1, %v452_v17, %v515_v18 }
 0x238   :  { %v2869_v21 = vmul.f32 %v531_v20, %v2866_v19 }
 0x23a   :  { %v563_v22 = vsel %vm94_vm0, %v2869_v21, -inf  ;;  %v373_v23 = vpop.f32.mrf.mxu2 }
 0x23b   :  { %564 = vmax.xlane.f32.xlu0 %v563_v22  ;;  %v455_v24 = vadd.f32 %v454_v12, %v373_v23  ;;  %v475_v22 = vpop.f32.mrf.mxu3 }
 0x23d   :  { %v516_v26 = vmul.f32 0.2, %v455_v24  ;;  %vm500_vm2 = vcmp.ge.f32.partialorder %v455_v24, 0.0 }
 0x23f   :  { %v532_v28 = vsel %vm500_vm2, %v455_v24, %v516_v26  ;;  %v2926_v24 = vld [vmem:[%s3549_s1 + $0x30] sm:$0xff] }
 0x240   :  { %v2879_v29 = vmul.f32 %v532_v28, %v2876_v27 }
 0x242   :  { %v376_v30 = vpop.f32.mrf.mxu2  ;;  %v566_v31 = vsel %vm94_vm0, %v2879_v29, -inf }
 0x243   :  { %v458_v32 = vadd.f32 %v457_v14, %v376_v30  ;;  %567 = vmax.xlane.f32.xlu0 %v566_v31  ;;  %v2916_v14 = vld [vmem:[%s3549_s1 + $0x28] sm:$0xff] }
 0x245   :  { %v517_v33 = vmul.f32 0.2, %v458_v32  ;;  %vm501_vm3 = vcmp.ge.f32.partialorder %v458_v32, 0.0 }
 0x247   :  { %v533_v36 = vsel %vm501_vm3, %v458_v32, %v517_v33  ;;  %v2936_v33 = vld [vmem:[%s3549_s1 + $0x38] sm:$0xff] }
 0x248   :  { %v2889_v37 = vmul.f32 %v533_v36, %v2886_v34  ;;  %v478_v36 = vpop.f32.mrf.mxu3 }
 0x24a   :  { %v379_v38 = vpop.f32.mrf.mxu2  ;;  %v569_v39 = vsel %vm94_vm0, %v2889_v37, -inf }
 0x24b   :  { %v461_v40 = vadd.f32 %v460_v16, %v379_v38  ;;  %570 = vmax.xlane.f32.xlu1 %v569_v39 }
 0x24d   :  { %v518_v41 = vmul.f32 0.2, %v461_v40  ;;  %vm502_vm4 = vcmp.ge.f32.partialorder %v461_v40, 0.0 }
 0x24f   :  { %v534_v43 = vsel %vm502_vm4, %v461_v40, %v518_v41 }
 0x250   :  { %v2899_v45 = vmul.f32 %v534_v43, %v2896_v42 }
 0x252   :  { %v382_v46 = vpop.f32.mrf.mxu2  ;;  %v572_v47 = vsel %vm94_vm0, %v2899_v45, -inf }
 0x253   :  { %v464_v48 = vadd.f32 %v463_v25, %v382_v46  ;;  %573 = vmax.xlane.f32.xlu1 %v572_v47  ;;  %v2949_v46 = vld [vmem:[%s3549_s1 + $0x40] sm:$0xff] }
 0x255   :  { %v519_v49 = vmul.f32 0.2, %v464_v48  ;;  %vm503_vm5 = vcmp.ge.f32.partialorder %v464_v48, 0.0 }
 0x257   :  { %v535_v51 = vsel %vm503_vm5, %v464_v48, %v519_v49  ;;  %v481_v48 = vpop.f32.mrf.mxu3 }
 0x258   :  { %v2909_v5 = vmul.f32 %v535_v51, %v2906_v50 }
 0x25a   :  { %v385_v10 = vpop.f32.mrf.mxu2  ;;  %v575_v11 = vsel %vm94_vm0, %v2909_v5, -inf }
 0x25b   :  { %v467_v12 = vadd.f32 %v466_v35, %v385_v10  ;;  %576 = vmax.xlane.f32.xlu2 %v575_v11  ;;  %v662_v35 = vld [vmem:[%s3555_s7 + $0x18] sm:$0xff] }
 0x25c   :  { %723 = vmatpush.msrb.mxu0 %v662_v35  ;;  %884 = vmatpush.msrb.mxu1 %v662_v35 }
 0x25d   :  { %v520_v13 = vmul.f32 0.2, %v467_v12  ;;  %vm504_vm6 = vcmp.ge.f32.partialorder %v467_v12, 0.0  ;;  %2205 = vmatpush.msra.mxu3 %v662_v35 }
 0x25f   :  { %v536_v15 = vsel %vm504_vm6, %v467_v12, %v520_v13  ;;  %v2959_v12 = vld [vmem:[%s3549_s1 + $0x48] sm:$0xff]  ;;  %v661_v13 = vld [vmem:[%s3555_s7 + $0x10] sm:$0xff] }
 0x260   :  { %v2919_v16 = vmul.f32 %v536_v15, %v2916_v14  ;;  %724 = vmatpush.msrb.mxu0 %v661_v13  ;;  %885 = vmatpush.msrb.mxu1 %v661_v13 }
 0x261   :  { %2206 = vmatpush.msra.mxu3 %v661_v13  ;;  %v1203_v13 = vld [vmem:[%s3556_s8 + $0x50] sm:$0xff] }
 0x262   :  { %v388_v17 = vpop.f32.mrf.mxu2  ;;  %v578_v18 = vsel %vm94_vm0, %v2919_v16, -inf }
 0x263   :  { %v470_v20 = vadd.f32 %v469_v44, %v388_v17  ;;  %579 = vmax.xlane.f32.xlu2 %v578_v18  ;;  %v484_v18 = vpop.f32.mrf.mxu3 }
 0x265   :  { %v521_v23 = vmul.f32 0.2, %v470_v20  ;;  %vm505_vm7 = vcmp.ge.f32.partialorder %v470_v20, 0.0 }
 0x267   :  { %v537_v25 = vsel %vm505_vm7, %v470_v20, %v521_v23 }
 0x268   :  { %v2929_v26 = vmul.f32 %v537_v25, %v2926_v24 }
 0x26a   :  { %v391_v28 = vpop.f32.mrf.mxu2  ;;  %v581_v30 = vsel %vm94_vm0, %v2929_v26, -inf }
 0x26b   :  { %v473_v31 = vadd.f32 %v472_v7, %v391_v28  ;;  %582 = vmax.xlane.f32.xlu0 %v581_v30  ;;  %v2972_v28 = vld [vmem:[%s3549_s1 + $0x50] sm:$0xff] }
 0x26d   :  { %v522_v32 = vmul.f32 0.2, %v473_v31  ;;  %vm506_vm8 = vcmp.ge.f32.partialorder %v473_v31, 0.0 }
 0x26f   :  { %v538_v38 = vsel %vm506_vm8, %v473_v31, %v522_v32 }
 0x270   :  { %v2942_v39 = vmul.f32 %v538_v38, %v2936_v33  ;;  %v487_v38 = vpop.f32.mrf.mxu3 }
 0x272   :  { %v394_v40 = vpop.f32.mrf.mxu2  ;;  %v584_v41 = vsel %vm94_vm0, %v2942_v39, -inf }
 0x273   :  { %v476_v43 = vadd.f32 %v475_v22, %v394_v40  ;;  %585 = vmax.xlane.f32.xlu1 %v584_v41  ;;  %v2982_v41 = vld [vmem:[%s3549_s1 + $0x58] sm:$0xff] }
 0x275   :  { %v523_v44 = vmul.f32 0.2, %v476_v43  ;;  %vm507_vm9 = vcmp.ge.f32.partialorder %v476_v43, 0.0 }
 0x277   :  { %v539_v47 = vsel %vm507_vm9, %v476_v43, %v523_v44  ;;  %v660_v44 = vld [vmem:[%s3555_s7 + $0x8] sm:$0xff] }
 0x278   :  { %v2952_v49 = vmul.f32 %v539_v47, %v2949_v46  ;;  %725 = vmatpush.msrb.mxu0 %v660_v44  ;;  %886 = vmatpush.msrb.mxu1 %v660_v44 }
 0x279   :  { %2207 = vmatpush.msra.mxu3 %v660_v44 }
 0x27a   :  { %v397_v51 = vpop.f32.mrf.mxu2  ;;  %v587_v7 = vsel %vm94_vm0, %v2952_v49, -inf }
 0x27b   :  { %v479_v10 = vadd.f32 %v478_v36, %v397_v51  ;;  %588 = vmax.xlane.f32.xlu2 %v587_v7 }
 0x27d   :  { %v524_v11 = vmul.f32 0.2, %v479_v10  ;;  %vm508_vm10 = vcmp.ge.f32.partialorder %v479_v10, 0.0 }
 0x27f   :  { %v540_v15 = vsel %vm508_vm10, %v479_v10, %v524_v11  ;;  %v1207_v10 = vld [vmem:[%s3556_s8 + $0x70] sm:$0xff] }
 0x280   :  { %v2965_v17 = vmul.f32 %v540_v15, %v2959_v12 }
 0x282   :  { %v400_v20 = vpop.f32.mrf.mxu2  ;;  %v590_v22 = vsel %vm94_vm0, %v2965_v17, -inf }
 0x283   :  { %v482_v23 = vadd.f32 %v481_v48, %v400_v20  ;;  %591 = vmax.xlane.f32.xlu0 %v590_v22  ;;  %v659_v48 = vld [vmem:[%s3555_s7] sm:$0xff]  ;;  %v490_v20 = vpop.f32.mrf.mxu3  ;;  %v1199_v22 = vld [vmem:[%s3556_s8 + $0x30] sm:$0xff] }
 0x284   :  { %726 = vmatpush.msrb.mxu0 %v659_v48  ;;  %887 = vmatpush.msrb.mxu1 %v659_v48 }
 0x285   :  { %v525_v25 = vmul.f32 0.2, %v482_v23  ;;  %vm509_vm11 = vcmp.ge.f32.partialorder %v482_v23, 0.0  ;;  %2208 = vmatpush.msra.mxu3 %v659_v48 }
 0x286   :  { %1399 = vmatpush.msra.mxu0 %v1207_v10 }
 0x287   :  { %v541_v30 = vsel %vm509_vm11, %v482_v23, %v525_v25  ;;  %2209 = vmatpush.msrb.mxu3 %v2781_v6 }
 0x288   :  { %v2975_v31 = vmul.f32 %v541_v30, %v2972_v28  ;;  %1400 = vmatpush.msra.mxu0 %v1203_v13  ;;  %v1195_v30 = vld [vmem:[%s3556_s8 + $0x10] sm:$0xff] }
 0x289   :  { %2210 = vmatpush.msrb.mxu3 %v2786_v8  ;;  %v3024_v8 = vld [vmem:[%s3549_s1 + $0x68] sm:$0xff] }
 0x28a   :  { %v403_v32 = vpop.f32.mrf.mxu2  ;;  %v593_v35 = vsel %vm94_vm0, %v2975_v31, -inf  ;;  %1401 = vmatpush.msra.mxu0 %v1199_v22 }
 0x28b   :  { %v485_v36 = vadd.f32 %v484_v18, %v403_v32  ;;  %594 = vmax.xlane.f32.xlu1 %v593_v35  ;;  %v3004_v18 = vld [vmem:[%s3549_s1 + $0x60] sm:$0xff]  ;;  %2211 = vmatpush.msrb.mxu3 %v2792_v4 }
 0x28c   :  { %1402 = vmatpush.msra.mxu0 %v1195_v30  ;;  %v3044_v30 = vld [vmem:[%s3549_s1 + $0x78] sm:$0xff] }
 0x28d   :  { %v526_v40 = vmul.f32 0.2, %v485_v36  ;;  %vm510_vm12 = vcmp.ge.f32.partialorder %v485_v36, 0.0  ;;  %2212 = vmatpush.msrb.mxu3 %v2798_v9  ;;  %v3034_v9 = vld [vmem:[%s3549_s1 + $0x70] sm:$0xff] }
 0x28f   :  { %v542_v43 = vsel %vm510_vm12, %v485_v36, %v526_v40  ;;  %v493_v40 = vpop.f32.mrf.mxu3 }
 0x290   :  { %v2988_v47 = vmul.f32 %v542_v43, %v2982_v41 }
 0x292   :  { %v406_v51 = vpop.f32.mrf.mxu2  ;;  %v596_v7 = vsel %vm94_vm0, %v2988_v47, -inf }
 0x293   :  { %v488_v11 = vadd.f32 %v487_v38, %v406_v51  ;;  %597 = vmax.xlane.f32.xlu2 %v596_v7 }
 0x295   :  { %v527_v15 = vmul.f32 0.2, %v488_v11  ;;  %vm511_vm13 = vcmp.ge.f32.partialorder %v488_v11, 0.0 }
 0x297   :  { %v543_v23 = vsel %vm511_vm13, %v488_v11, %v527_v15  ;;  %v496_v11 = vpop.f32.mrf.mxu3 }
 0x298   :  { %v3012_v25 = vmul.f32 %v543_v23, %v3004_v18 }
 0x29a   :  { %v409_v6 = vpop.f32.mrf.mxu2  ;;  %v599_v32 = vsel %vm94_vm0, %v3012_v25, -inf }
 0x29b   :  { %v491_v35 = vadd.f32 %v490_v20, %v409_v6  ;;  %600 = vmax.xlane.f32.xlu0 %v599_v32 }
 0x29d   :  { %v528_v36 = vmul.f32 0.2, %v491_v35  ;;  %vm512_vm14 = vcmp.ge.f32.partialorder %v491_v35, 0.0 }
 0x29f   :  { %v544_v38 = vsel %vm512_vm14, %v491_v35, %v528_v36 }
 0x2a0   :  { %v3027_v43 = vmul.f32 %v544_v38, %v3024_v8 }
 0x2a2   :  { %v412_v4 = vpop.f32.mrf.mxu2  ;;  %v602_v44 = vsel %vm94_vm0, %v3027_v43, -inf }
 0x2a3   :  { %v494_v48 = vadd.f32 %v493_v40, %v412_v4  ;;  %603 = vmax.xlane.f32.xlu1 %v602_v44  ;;  %v1692_v40 = vld [vmem:[#allocation5 + $0x178] sm:$0xff] }
 0x2a5   :  { %v529_v51 = vmul.f32 0.2, %v494_v48  ;;  %vm513_vm15 = vcmp.ge.f32.partialorder %v494_v48, 0.0 }
 0x2a7   :  { %v545_v7 = vsel %vm513_vm15, %v494_v48, %v529_v51  ;;  %v1691_v48 = vld [vmem:[#allocation5 + $0x170] sm:$0xff] }
 0x2a8   :  { %v3037_v10 = vmul.f32 %v545_v7, %v3034_v9  ;;  %v1756_v7 = vmul.f32 %v1692_v40, %v2723_v3 }
 0x2aa   :  { %v415_v13 = vpop.f32.mrf.mxu2  ;;  %v605_v15 = vsel %vm94_vm0, %v3037_v10, -inf }
 0x2ab   :  { %v497_v20 = vadd.f32 %v496_v11, %v415_v13  ;;  %606 = vmax.xlane.f32.xlu2 %v605_v15  ;;  %v1690_v11 = vld [vmem:[#allocation5 + $0x168] sm:$0xff]  ;;  %v1755_v13 = vmul.f32 %v1691_v48, %v2719_v2  ;;  %v1689_v15 = vld [vmem:[#allocation5 + $0x160] sm:$0xff] }
 0x2ac   :  { %v1685_v48 = vld [vmem:[#allocation5 + $0x140] sm:$0xff] }
 0x2ad   :  { %v530_v22 = vmul.f32 0.2, %v497_v20  ;;  %vm514_vm1 = vcmp.ge.f32.partialorder %v497_v20, 0.0 }
 0x2ae   :  { %v565_v23 = vpop.xlane.xlu0 %564 }
 0x2af   :  { %v611_v6 = vsub.f32 %v2869_v21, %v565_v23  ;;  %v546_v32 = vsel %vm514_vm1, %v497_v20, %v530_v22  ;;  %v1754_v20 = vmul.f32 %v1690_v11, %v2715_v1  ;;  %v1753_v22 = vmul.f32 %v1689_v15, %v2709_v0  ;;  %v1688_v23 = vld [vmem:[#allocation5 + $0x158] sm:$0xff]  ;;  %v1683_v15 = vld [vmem:[#allocation5 + $0x130] sm:$0xff] }
 0x2b0   :  { %v3048_v36 = vmul.f32 %v546_v32, %v3044_v30  ;;  %v1687_v32 = vld [vmem:[#allocation5 + $0x150] sm:$0xff]  ;;  %v1752_v40 = vmul.f32 %v1688_v23, %v2705_v63  ;;  %v1682_v23 = vld [vmem:[#allocation5 + $0x128] sm:$0xff] }
 0x2b1   :  { %v627_v35 = vmul.f32 1.442695, %v611_v6 }
 0x2b2   :  { %v608_v38 = vsel %vm94_vm0, %v3048_v36, -inf }
 0x2b3   :  { %2221 = vpow2.f32 %v627_v35  ;;  %609 = vmax.xlane.f32.xlu0 %v608_v38 }
 0x2b6   :  { %v568_v4 = vpop.xlane.xlu0 %567 }
 0x2b7   :  { %v612_v44 = vsub.f32 %v2879_v29, %v568_v4  ;;  %v1686_v4 = vld [vmem:[#allocation5 + $0x148] sm:$0xff] }
 0x2b9   :  { %v3053_v51 = vpop.eup %2221  ;;  %v629_v21 = vmul.f32 1.442695, %v612_v44  ;;  %v1751_v44 = vmul.f32 %v1687_v32, %v2699_v61  ;;  %v1681_v32 = vld [vmem:[#allocation5 + $0x120] sm:$0xff] }
 0x2ba   :  { %2089 = vmatmul.msk.f32.vlgmr.msrb.gmra.mxu0 %vm94_vm0, %v3053_v51 }
 0x2bb   :  { %1907 = vmatpush.msrb.mxu0 %v1756_v7  ;;  %2223 = vpow2.f32 %v629_v21  ;;  %v1750_v7 = vmul.f32 %v1686_v4, %v2701_v62  ;;  %v1684_v21 = vld [vmem:[#allocation5 + $0x138] sm:$0xff] }
 0x2bd   :  { %1908 = vmatpush.msrb.mxu0 %v1755_v13  ;;  %v1749_v13 = vmul.f32 %v1685_v48, %v2695_v60  ;;  %v1679_v48 = vld [vmem:[#allocation5 + $0x110] sm:$0xff] }
 0x2be   :  { %v571_v29 = vpop.xlane.xlu1 %570 }
 0x2bf   :  { %1909 = vmatpush.msrb.mxu0 %v1754_v20  ;;  %v613_v6 = vsub.f32 %v2889_v37, %v571_v29 }
 0x2c1   :  { %1910 = vmatpush.msrb.mxu0 %v1753_v22  ;;  %v3062_v35 = vpop.eup %2223  ;;  %v631_v38 = vmul.f32 1.442695, %v613_v6  ;;  %v1748_v22 = vmul.f32 %v1684_v21, %v2691_v59  ;;  %v1747_v6 = vmul.f32 %v1683_v15, %v2687_v58  ;;  %v1677_v15 = vld [vmem:[#allocation5 + $0x100] sm:$0xff] }
 0x2c2   :  { %2090 = vmatmul.msk.f32.gmra.mxu0 %vm94_vm0, %v3062_v35 }
 0x2c3   :  { %2225 = vpow2.f32 %v631_v38  ;;  %1911 = vmatpush.msrb.mxu0 %v1752_v40  ;;  %v1680_v40 = vld [vmem:[#allocation5 + $0x118] sm:$0xff] }
 0x2c4   :  { %v1744_v21 = vmul.f32 %v1680_v40, %v2675_v55 }
 0x2c5   :  { %1912 = vmatpush.msrb.mxu0 %v1751_v44  ;;  %v1745_v44 = vmul.f32 %v1681_v32, %v2679_v56 }
 0x2c6   :  { %v574_v37 = vpop.xlane.xlu1 %573 }
 0x2c7   :  { %1913 = vmatpush.msrb.mxu0 %v1750_v7  ;;  %v614_v11 = vsub.f32 %v2899_v45, %v574_v37  ;;  %v1746_v45 = vmul.f32 %v1682_v23, %v2683_v57  ;;  %v1741_v23 = vmul.f32 %v1677_v15, %v2663_v52 }
 0x2c9   :  { %v3071_v20 = vpop.eup %2225  ;;  %v633_v29 = vmul.f32 1.442695, %v614_v11  ;;  %1914 = vmatpush.msrb.mxu0 %v1749_v13  ;;  %v1678_v11 = vld [vmem:[#allocation5 + $0x108] sm:$0xff]  ;;  %v1743_v13 = vmul.f32 %v1679_v48, %v2671_v54 }
 0x2ca   :  { %2091 = vmatmul.msk.f32.gmra.mxu0 %vm94_vm0, %v3071_v20 }
 0x2cb   :  { %2227 = vpow2.f32 %v633_v29  ;;  %1915 = vmatpush.msrb.mxu0 %v1748_v22 }
 0x2cd   :  { %1916 = vmatpush.msrb.mxu0 %v1747_v6 }
 0x2ce   :  { %v577_v38 = vpop.xlane.xlu2 %576 }
 0x2cf   :  { %1917 = vmatpush.msrb.mxu0 %v1746_v45  ;;  %v615_v4 = vsub.f32 %v2909_v5, %v577_v38  ;;  %v1742_v5 = vmul.f32 %v1678_v11, %v2667_v53 }
 0x2d1   :  { %v3080_v7 = vpop.eup %2227  ;;  %v635_v37 = vmul.f32 1.442695, %v615_v4  ;;  %1918 = vmatpush.msrb.mxu0 %v1745_v44 }
 0x2d2   :  { %2092 = vmatmul.msk.f32.gmra.mxu0 %vm94_vm0, %v3080_v7 }
 0x2d3   :  { %2229 = vpow2.f32 %v635_v37  ;;  %1919 = vmatpush.msrb.mxu0 %v1744_v21 }
 0x2d5   :  { %1920 = vmatpush.msrb.mxu0 %v1743_v13 }
 0x2d6   :  { %v580_v29 = vpop.xlane.xlu2 %579 }
 0x2d7   :  { %1921 = vmatpush.msrb.mxu0 %v1742_v5  ;;  %v616_v22 = vsub.f32 %v2919_v16, %v580_v29 }
 0x2d9   :  { %v3089_v6 = vpop.eup %2229  ;;  %v637_v32 = vmul.f32 1.442695, %v616_v22  ;;  %1922 = vmatpush.msrb.mxu0 %v1741_v23 }
 0x2da   :  { %2093 = vmatmul.msk.f32.gmra.mxu0 %vm94_vm0, %v3089_v6 }
 0x2db   :  { %2231 = vpow2.f32 %v637_v32 }
 0x2de   :  { %v583_v45 = vpop.xlane.xlu0 %582 }
 0x2df   :  { %v617_v38 = vsub.f32 %v2929_v26, %v583_v45 }
 0x2e1   :  { %v3094_v40 = vpop.eup %2231  ;;  %v639_v4 = vmul.f32 1.442695, %v617_v38 }
 0x2e2   :  { %2094 = vmatmul.msk.f32.gmra.mxu0 %vm94_vm0, %v3094_v40 }
 0x2e3   :  { %2233 = vpow2.f32 %v639_v4 }
 0x2e6   :  { %v586_v16 = vpop.xlane.xlu1 %585 }
 0x2e7   :  { %v618_v44 = vsub.f32 %v2942_v39, %v586_v16 }
 0x2e9   :  { %v3099_v48 = vpop.eup %2233  ;;  %v641_v37 = vmul.f32 1.442695, %v618_v44 }
 0x2ea   :  { %2095 = vmatmul.msk.f32.gmra.mxu0 %vm94_vm0, %v3099_v48 }
 0x2eb   :  { %2235 = vpow2.f32 %v641_v37 }
 0x2ee   :  { %v589_v21 = vpop.xlane.xlu2 %588 }
 0x2ef   :  { %v619_v26 = vsub.f32 %v2952_v49, %v589_v21 }
 0x2f1   :  { %v3104_v11 = vpop.eup %2235  ;;  %v643_v13 = vmul.f32 1.442695, %v619_v26 }
 0x2f2   :  { %2096 = vmatmul.msk.f32.gmra.mxu0 %vm94_vm0, %v3104_v11 }
 0x2f3   :  { %2237 = vpow2.f32 %v643_v13 }
 0x2f6   :  { %v592_v15 = vpop.xlane.xlu0 %591 }
 0x2f7   :  { %v620_v39 = vsub.f32 %v2965_v17, %v592_v15 }
 0x2f9   :  { %v3109_v5 = vpop.eup %2237  ;;  %v645_v29 = vmul.f32 1.442695, %v620_v39  ;;  %v1204_v39 = vld [vmem:[%s3556_s8 + $0x58] sm:$0xff] }
 0x2fa   :  { %2097 = vmatmul.msk.f32.gmra.mxu0 %vm94_vm0, %v3109_v5 }
 0x2fb   :  { %2239 = vpow2.f32 %v645_v29 }
 0x2fe   :  { %v595_v22 = vpop.xlane.xlu1 %594 }
 0x2ff   :  { %v621_v49 = vsub.f32 %v2975_v31, %v595_v22  ;;  %v1196_v22 = vld [vmem:[%s3556_s8 + $0x18] sm:$0xff] }
 0x301   :  { %v3114_v23 = vpop.eup %2239  ;;  %v647_v32 = vmul.f32 1.442695, %v621_v49 }
 0x302   :  { %2098 = vmatmul.msk.f32.gmra.mxu0 %vm94_vm0, %v3114_v23 }
 0x303   :  { %2241 = vpow2.f32 %v647_v32 }
 0x306   :  { %v598_v45 = vpop.xlane.xlu2 %597 }
 0x307   :  { %v622_v17 = vsub.f32 %v2988_v47, %v598_v45 }
 0x309   :  { %v3119_v38 = vpop.eup %2241  ;;  %v649_v4 = vmul.f32 1.442695, %v622_v17 }
 0x30a   :  { %2099 = vmatmul.msk.f32.gmra.mxu0 %vm94_vm0, %v3119_v38 }
 0x30b   :  { %2243 = vpow2.f32 %v649_v4 }
 0x30e   :  { %v601_v16 = vpop.xlane.xlu0 %600 }
 0x30f   :  { %v623_v31 = vsub.f32 %v3012_v25, %v601_v16  ;;  %v1208_v25 = vld [vmem:[%s3556_s8 + $0x78] sm:$0xff] }
 0x310   :  { %1464 = vmatpush.msra.mxu1 %v1208_v25  ;;  %v1707_v25 = vld [vmem:[#allocation5 + $0x1f0] sm:$0xff] }
 0x311   :  { %v3124_v44 = vpop.eup %2243  ;;  %v651_v37 = vmul.f32 1.442695, %v623_v31 }
 0x312   :  { %2100 = vmatmul.msk.f32.gmra.mxu0 %vm94_vm0, %v3124_v44  ;;  %1465 = vmatpush.msra.mxu1 %v1204_v39  ;;  %v1706_v39 = vld [vmem:[#allocation5 + $0x1e8] sm:$0xff] }
 0x313   :  { %2245 = vpow2.f32 %v651_v37 }
 0x316   :  { %v604_v21 = vpop.xlane.xlu1 %603 }
 0x317   :  { %v624_v47 = vsub.f32 %v3027_v43, %v604_v21  ;;  %v1200_v43 = vld [vmem:[%s3556_s8 + $0x38] sm:$0xff] }
 0x318   :  { %1466 = vmatpush.msra.mxu1 %v1200_v43  ;;  %v1705_v43 = vld [vmem:[#allocation5 + $0x1e0] sm:$0xff] }
 0x319   :  { %v3129_v26 = vpop.eup %2245  ;;  %v653_v13 = vmul.f32 1.442695, %v624_v47  ;;  %v1708_v47 = vld [vmem:[#allocation5 + $0x1f8] sm:$0xff] }
 0x31a   :  { %2101 = vmatmul.msk.f32.gmra.mxu0 %vm94_vm0, %v3129_v26  ;;  %1467 = vmatpush.msra.mxu1 %v1196_v22 }
 0x31b   :  { %2247 = vpow2.f32 %v653_v13 }
 0x31e   :  { %v607_v15 = vpop.xlane.xlu2 %606 }
 0x31f   :  { %v625_v29 = vsub.f32 %v3037_v10, %v607_v15  ;;  %v1772_v15 = vmul.f32 %v1708_v47, %v2723_v3  ;;  %v1702_v47 = vld [vmem:[#allocation5 + $0x1c8] sm:$0xff] }
 0x321   :  { %v3146_v49 = vpop.eup %2247  ;;  %v655_v32 = vmul.f32 1.442695, %v625_v29  ;;  %v1771_v29 = vmul.f32 %v1707_v25, %v2719_v2  ;;  %v1701_v25 = vld [vmem:[#allocation5 + $0x1c0] sm:$0xff] }
 0x322   :  { %2102 = vmatmul.msk.f32.gmra.mxu0 %vm94_vm0, %v3146_v49 }
 0x323   :  { %2249 = vpow2.f32 %v655_v32 }
 0x326   :  { %v610_v45 = vpop.xlane.xlu0 %609 }
 0x327   :  { %v626_v10 = vsub.f32 %v3048_v36, %v610_v45  ;;  %v1769_v45 = vmul.f32 %v1705_v43, %v2709_v0  ;;  %v1765_v43 = vmul.f32 %v1701_v25, %v2695_v60 }
 0x329   :  { %v3151_v17 = vpop.eup %2249  ;;  %v657_v4 = vmul.f32 1.442695, %v626_v10 }
 0x32a   :  { %2103 = vmatmul.msk.f32.gmra.mxu0 %vm94_vm0, %v3151_v17 }
 0x32b   :  { %2251 = vpow2.f32 %v657_v4  ;;  %v1704_v4 = vld [vmem:[#allocation5 + $0x1d8] sm:$0xff] }
 0x331   :  { %v3155_v16 = vpop.eup %2251 }
 0x332   :  { %2104 = vmatmul.msk.f32.gmra.mxu0 %vm94_vm0, %v3155_v16 }
 0x337   :  { %v728_v31 = vpop.f32.mrf.mxu0 }
 0x338   :  { %2253 = vrcp.f32 %v728_v31 }
 0x33e   :  { %v2254_v37 = vpop.eup %2253 }
 0x33f   :  { %v792_v21 = vmul.f32 %v2254_v37, %v3053_v51  ;;  %v731_v13 = vpop.f32.mrf.mxu0  ;;  %v1770_v51 = vmul.f32 %v1706_v39, %v2715_v1  ;;  %v1703_v37 = vld [vmem:[#allocation5 + $0x1d0] sm:$0xff] }
 0x340   :  { %2255 = vrcp.f32 %v731_v13  ;;  %v1767_v13 = vmul.f32 %v1703_v37, %v2699_v61 }
 0x341   :  { %v3161_v36 = vmul.f32 %v792_v21, %v2866_v19  ;;  %v1768_v21 = vmul.f32 %v1704_v4, %v2705_v63 }
 0x343   :  { %2105 = vmatmul.msk.f32.vlgmr.msrb.gmra.mxu1 %vm94_vm0, %v3161_v36 }
 0x344   :  { %1972 = vmatpush.msrb.mxu1 %v1772_v15 }
 0x346   :  { %1973 = vmatpush.msrb.mxu1 %v1771_v29  ;;  %v2256_v22 = vpop.eup %2255 }
 0x347   :  { %v734_v32 = vpop.f32.mrf.mxu0  ;;  %v793_v10 = vmul.f32 %v2256_v22, %v3062_v35  ;;  %v1766_v35 = vmul.f32 %v1702_v47, %v2701_v62  ;;  %v1699_v22 = vld [vmem:[#allocation5 + $0x1b0] sm:$0xff]  ;;  %v1696_v47 = vld [vmem:[#allocation5 + $0x198] sm:$0xff] }
 0x348   :  { %1974 = vmatpush.msrb.mxu1 %v1770_v51  ;;  %2257 = vrcp.f32 %v734_v32 }
 0x349   :  { %v3171_v31 = vmul.f32 %v793_v10, %v2876_v27  ;;  %v1700_v27 = vld [vmem:[#allocation5 + $0x1b8] sm:$0xff]  ;;  %v1763_v10 = vmul.f32 %v1699_v22, %v2687_v58 }
 0x34a   :  { %1975 = vmatpush.msrb.mxu1 %v1769_v45  ;;  %v1764_v32 = vmul.f32 %v1700_v27, %v2691_v59  ;;  %v1698_v45 = vld [vmem:[#allocation5 + $0x1a8] sm:$0xff] }
 0x34b   :  { %2106 = vmatmul.msk.f32.gmra.mxu1 %vm94_vm0, %v3171_v31  ;;  %v1762_v37 = vmul.f32 %v1698_v45, %v2683_v57 }
 0x34c   :  { %1976 = vmatpush.msrb.mxu1 %v1768_v21 }
 0x34e   :  { %v2258_v15 = vpop.eup %2257  ;;  %1977 = vmatpush.msrb.mxu1 %v1767_v13 }
 0x34f   :  { %v737_v39 = vpop.f32.mrf.mxu0  ;;  %v794_v29 = vmul.f32 %v2258_v15, %v3071_v20  ;;  %v1697_v20 = vld [vmem:[#allocation5 + $0x1a0] sm:$0xff]  ;;  %v1695_v15 = vld [vmem:[#allocation5 + $0x190] sm:$0xff] }
 0x350   :  { %2259 = vrcp.f32 %v737_v39  ;;  %1978 = vmatpush.msrb.mxu1 %v1766_v35  ;;  %v1761_v13 = vmul.f32 %v1697_v20, %v2679_v56  ;;  %v1760_v35 = vmul.f32 %v1696_v47, %v2675_v55  ;;  %v1694_v39 = vld [vmem:[#allocation5 + $0x188] sm:$0xff] }
 0x351   :  { %v3181_v51 = vmul.f32 %v794_v29, %v2886_v34  ;;  %v1759_v29 = vmul.f32 %v1695_v15, %v2671_v54 }
 0x352   :  { %1979 = vmatpush.msrb.mxu1 %v1765_v43  ;;  %v1758_v43 = vmul.f32 %v1694_v39, %v2667_v53 }
 0x353   :  { %2107 = vmatmul.msk.f32.gmra.mxu1 %vm94_vm0, %v3181_v51 }
 0x354   :  { %1980 = vmatpush.msrb.mxu1 %v1764_v32 }
 0x356   :  { %v2260_v4 = vpop.eup %2259  ;;  %1981 = vmatpush.msrb.mxu1 %v1763_v10 }
 0x357   :  { %v740_v21 = vpop.f32.mrf.mxu0  ;;  %v795_v34 = vmul.f32 %v2260_v4, %v3080_v7  ;;  %v1693_v7 = vld [vmem:[#allocation5 + $0x180] sm:$0xff] }
 0x358   :  { %2261 = vrcp.f32 %v740_v21  ;;  %1982 = vmatpush.msrb.mxu1 %v1762_v37  ;;  %v1757_v32 = vmul.f32 %v1693_v7, %v2663_v52 }
 0x359   :  { %v3191_v25 = vmul.f32 %v795_v34, %v2896_v42 }
 0x35a   :  { %1983 = vmatpush.msrb.mxu1 %v1761_v13 }
 0x35b   :  { %2108 = vmatmul.msk.f32.gmra.mxu1 %vm94_vm0, %v3191_v25 }
 0x35c   :  { %1984 = vmatpush.msrb.mxu1 %v1760_v35 }
 0x35e   :  { %v2262_v27 = vpop.eup %2261  ;;  %1985 = vmatpush.msrb.mxu1 %v1759_v29 }
 0x35f   :  { %v743_v22 = vpop.f32.mrf.mxu0  ;;  %v796_v42 = vmul.f32 %v2262_v27, %v3089_v6 }
 0x360   :  { %2263 = vrcp.f32 %v743_v22  ;;  %1986 = vmatpush.msrb.mxu1 %v1758_v43 }
 0x361   :  { %v3201_v45 = vmul.f32 %v796_v42, %v2906_v50 }
 0x362   :  { %1987 = vmatpush.msrb.mxu1 %v1757_v32 }
 0x363   :  { %2109 = vmatmul.msk.f32.gmra.mxu1 %vm94_vm0, %v3201_v45 }
 0x366   :  { %v2264_v10 = vpop.eup %2263 }
 0x367   :  { %v746_v20 = vpop.f32.mrf.mxu0  ;;  %v797_v4 = vmul.f32 %v2264_v10, %v3094_v40 }
 0x368   :  { %2265 = vrcp.f32 %v746_v20 }
 0x369   :  { %v3207_v37 = vmul.f32 %v797_v4, %v2916_v14 }
 0x36b   :  { %2110 = vmatmul.msk.f32.gmra.mxu1 %vm94_vm0, %v3207_v37 }
 0x36e   :  { %v2266_v6 = vpop.eup %2265 }
 0x36f   :  { %v749_v21 = vpop.f32.mrf.mxu0  ;;  %v798_v50 = vmul.f32 %v2266_v6, %v3099_v48 }
 0x370   :  { %2267 = vrcp.f32 %v749_v21 }
 0x371   :  { %v3213_v34 = vmul.f32 %v798_v50, %v2926_v24 }
 0x373   :  { %2111 = vmatmul.msk.f32.gmra.mxu1 %vm94_vm0, %v3213_v34 }
 0x376   :  { %v2268_v47 = vpop.eup %2267 }
 0x377   :  { %v752_v40 = vpop.f32.mrf.mxu0  ;;  %v799_v13 = vmul.f32 %v2268_v47, %v3104_v11 }
 0x378   :  { %2269 = vrcp.f32 %v752_v40 }
 0x379   :  { %v3219_v14 = vmul.f32 %v799_v13, %v2936_v33 }
 0x37b   :  { %2112 = vmatmul.msk.f32.gmra.mxu1 %vm94_vm0, %v3219_v14 }
 0x37e   :  { %v2270_v15 = vpop.eup %2269 }
 0x37f   :  { %v755_v48 = vpop.f32.mrf.mxu0  ;;  %v800_v35 = vmul.f32 %v2270_v15, %v3109_v5 }
 0x380   :  { %2271 = vrcp.f32 %v755_v48 }
 0x381   :  { %v3225_v24 = vmul.f32 %v800_v35, %v2949_v46 }
 0x383   :  { %2113 = vmatmul.msk.f32.gmra.mxu1 %vm94_vm0, %v3225_v24 }
 0x386   :  { %v2272_v39 = vpop.eup %2271 }
 0x387   :  { %v758_v11 = vpop.f32.mrf.mxu0  ;;  %v801_v29 = vmul.f32 %v2272_v39, %v3114_v23 }
 0x388   :  { %2273 = vrcp.f32 %v758_v11 }
 0x389   :  { %v3231_v33 = vmul.f32 %v801_v29, %v2959_v12 }
 0x38b   :  { %2114 = vmatmul.msk.f32.gmra.mxu1 %vm94_vm0, %v3231_v33 }
 0x38e   :  { %v2274_v7 = vpop.eup %2273 }
 0x38f   :  { %v761_v5 = vpop.f32.mrf.mxu0  ;;  %v802_v27 = vmul.f32 %v2274_v7, %v3119_v38 }
 0x390   :  { %2275 = vrcp.f32 %v761_v5 }
 0x391   :  { %v3237_v46 = vmul.f32 %v802_v27, %v2972_v28 }
 0x393   :  { %2115 = vmatmul.msk.f32.gmra.mxu1 %vm94_vm0, %v3237_v46 }
 0x396   :  { %v2276_v43 = vpop.eup %2275 }
 0x397   :  { %v764_v23 = vpop.f32.mrf.mxu0  ;;  %v803_v22 = vmul.f32 %v2276_v43, %v3124_v44 }
 0x398   :  { %2277 = vrcp.f32 %v764_v23 }
 0x399   :  { %v3243_v12 = vmul.f32 %v803_v22, %v2982_v41 }
 0x39b   :  { %2116 = vmatmul.msk.f32.gmra.mxu1 %vm94_vm0, %v3243_v12 }
 0x39e   :  { %v2278_v42 = vpop.eup %2277 }
 0x39f   :  { %v767_v38 = vpop.f32.mrf.mxu0  ;;  %v804_v32 = vmul.f32 %v2278_v42, %v3129_v26 }
 0x3a0   :  { %2279 = vrcp.f32 %v767_v38 }
 0x3a1   :  { %v3249_v28 = vmul.f32 %v804_v32, %v3004_v18 }
 0x3a3   :  { %2117 = vmatmul.msk.f32.gmra.mxu1 %vm94_vm0, %v3249_v28 }
 0x3a6   :  { %v2280_v10 = vpop.eup %2279 }
 0x3a7   :  { %v770_v44 = vpop.f32.mrf.mxu0  ;;  %v805_v20 = vmul.f32 %v2280_v10, %v3146_v49 }
 0x3a8   :  { %2281 = vrcp.f32 %v770_v44 }
 0x3a9   :  { %v3255_v41 = vmul.f32 %v805_v20, %v3024_v8 }
 0x3ab   :  { %2118 = vmatmul.msk.f32.gmra.mxu1 %vm94_vm0, %v3255_v41 }
 0x3ae   :  { %v2282_v4 = vpop.eup %2281 }
 0x3af   :  { %v773_v26 = vpop.f32.mrf.mxu0  ;;  %v806_v6 = vmul.f32 %v2282_v4, %v3151_v17 }
 0x3b0   :  { %2283 = vrcp.f32 %v773_v26 }
 0x3b1   :  { %v3261_v18 = vmul.f32 %v806_v6, %v3034_v9 }
 0x3b3   :  { %2119 = vmatmul.msk.f32.gmra.mxu1 %vm94_vm0, %v3261_v18 }
 0x3b6   :  { %v2284_v21 = vpop.eup %2283 }
 0x3b7   :  { %v807_v49 = vmul.f32 %v2284_v21, %v3155_v16 }
 0x3b9   :  { %v3267_v8 = vmul.f32 %v807_v49, %v3044_v30 }
 0x3bb   :  { %2120 = vmatmul.msk.f32.vlgmr.msra.gmra.mxu3 %vm94_vm0, %v3267_v8 }
 0x3c0   :  { %v889_v50 = vpop.f32.mrf.mxu1 }
 0x3c1   :  { %2285 = vrcp.f32 %v889_v50  ;;  %v948_v9 = vand.u32 2147483648, %v889_v50  ;;  %v946_v48 = vand.u32 2147483647, %v889_v50  ;;  %vm942_vm3 = vweird.f32 %v889_v50 }
 0x3c3   :  { %v949_v16 = vor.u32 1.1754944e-38, %v948_v9  ;;  %vm947_vm5 = vcmp.eq.f32.partialorder %v946_v48, 8.507059e+37 }
 0x3c7   :  { %v2286_v47 = vpop.eup %2285 }
 0x3c8   :  { %v938_v17 = vmul.f32 %v2286_v47, %v889_v50  ;;  %v892_v40 = vpop.f32.mrf.mxu1  ;;  %vm943_vm2 = vweird.f32 %v2286_v47  ;;  %v2317_v50 = vld [vmem:[%s3549_s1 + $0x8] sm:$0xff] }
 0x3c9   :  { %2287 = vrcp.f32 %v892_v40  ;;  %vm944_vm4 = vmor %vm942_vm3, %vm943_vm2  ;;  %v963_v22 = vand.u32 2147483648, %v892_v40  ;;  %v961_v42 = vand.u32 2147483647, %v892_v40  ;;  %vm957_vm7 = vweird.f32 %v892_v40 }
 0x3ca   :  { %v939_v13 = vsub.f32 1.0, %v938_v17 }
 0x3cb   :  { %v964_v32 = vor.u32 1.1754944e-38, %v963_v22  ;;  %vm962_vm9 = vcmp.eq.f32.partialorder %v961_v42, 8.507059e+37 }
 0x3cc   :  { %v940_v15 = vmul.f32 %v2286_v47, %v939_v13 }
 0x3ce   :  { %v941_v35 = vadd.f32 %v2286_v47, %v940_v15 }
 0x3cf   :  { %v2288_v30 = vpop.eup %2287 }
 0x3d0   :  { %v945_v39 = vsel %vm944_vm4, %v2286_v47, %v941_v35  ;;  %v953_v29 = vmul.f32 %v2288_v30, %v892_v40  ;;  %v895_v7 = vpop.f32.mrf.mxu1  ;;  %vm958_vm6 = vweird.f32 %v2288_v30 }
 0x3d1   :  { %v950_v11 = vsel %vm947_vm5, %v949_v16, %v945_v39  ;;  %2289 = vrcp.f32 %v895_v7  ;;  %vm959_vm8 = vmor %vm957_vm7, %vm958_vm6  ;;  %v978_v21 = vand.u32 2147483648, %v895_v7  ;;  %v976_v49 = vand.u32 2147483647, %v895_v7 }
 0x3d2   :  { %v951_v5 = vmul.f32 %v950_v11, %v3161_v36  ;;  %v954_v27 = vsub.f32 1.0, %v953_v29  ;;  %vm972_vm11 = vweird.f32 %v895_v7  ;;  %v2318_v29 = vld [vmem:[%s3549_s1 + $0x10] sm:$0xff] }
 0x3d3   :  { %vm977_vm13 = vcmp.eq.f32.partialorder %v976_v49, 8.507059e+37 }
 0x3d4   :  { %v3273_v43 = vmul.f32 %v951_v5, %v2866_v19  ;;  %v955_v23 = vmul.f32 %v2288_v30, %v954_v27 }
 0x3d6   :  { %2121 = vmatmul.msk.f32.vlgmr.msra.gmra.mxu2 %vm94_vm0, %v3273_v43  ;;  %2153 = vmatmul.msk.f32.vlgmr.msra.gmra.mxu0 %vm94_vm0, %v3273_v43  ;;  %v956_v38 = vadd.f32 %v2288_v30, %v955_v23 }
 0x3d7   :  { %2169 = vmatmul.msk.f32.vlgmr.msra.gmra.mxu1 %vm94_vm0, %v3273_v43  ;;  %v2290_v36 = vpop.eup %2289 }
 0x3d8   :  { %v968_v19 = vmul.f32 %v2290_v36, %v895_v7  ;;  %v898_v10 = vpop.f32.mrf.mxu1  ;;  %v960_v44 = vsel %vm959_vm8, %v2288_v30, %v956_v38  ;;  %vm973_vm10 = vweird.f32 %v2290_v36 }
 0x3d9   :  { %2291 = vrcp.f32 %v898_v10  ;;  %v965_v4 = vsel %vm962_vm9, %v964_v32, %v960_v44  ;;  %vm974_vm12 = vmor %vm972_vm11, %vm973_vm10  ;;  %v993_v39 = vand.u32 2147483648, %v898_v10  ;;  %v991_v11 = vand.u32 2147483647, %v898_v10 }
 0x3da   :  { %v969_v20 = vsub.f32 1.0, %v968_v19  ;;  %v966_v26 = vmul.f32 %v965_v4, %v3171_v31  ;;  %v979_v31 = vor.u32 1.1754944e-38, %v978_v21  ;;  %vm987_vm15 = vweird.f32 %v898_v10 }
 0x3db   :  { %vm992_vm2 = vcmp.eq.f32.partialorder %v991_v11, 8.507059e+37 }
 0x3dc   :  { %v970_v6 = vmul.f32 %v2290_v36, %v969_v20  ;;  %v3285_v47 = vmul.f32 %v2317_v50, %v966_v26  ;;  %v2319_v20 = vld [vmem:[%s3549_s1 + $0x18] sm:$0xff] }
 0x3de   :  { %v971_v17 = vadd.f32 %v2290_v36, %v970_v6  ;;  %2122 = vmatmul.msk.f32.gmra.mxu2 %vm94_vm0, %v3285_v47  ;;  %2154 = vmatmul.msk.f32.gmra.mxu0 %vm94_vm0, %v3285_v47 }
 0x3df   :  { %v2292_v40 = vpop.eup %2291  ;;  %2170 = vmatmul.msk.f32.gmra.mxu1 %vm94_vm0, %v3285_v47 }
 0x3e0   :  { %v983_v13 = vmul.f32 %v2292_v40, %v898_v10  ;;  %v901_v9 = vpop.f32.mrf.mxu1  ;;  %v975_v15 = vsel %vm974_vm12, %v2290_v36, %v971_v17  ;;  %vm988_vm14 = vweird.f32 %v2292_v40 }
 0x3e1   :  { %2293 = vrcp.f32 %v901_v9  ;;  %v980_v35 = vsel %vm977_vm13, %v979_v31, %v975_v15  ;;  %vm989_vm1 = vmor %vm987_vm15, %vm988_vm14  ;;  %v1008_v10 = vand.u32 2147483648, %v901_v9  ;;  %v1006_v44 = vand.u32 2147483647, %v901_v9 }
 0x3e2   :  { %v984_v48 = vsub.f32 1.0, %v983_v13  ;;  %v981_v16 = vmul.f32 %v980_v35, %v3181_v51  ;;  %v994_v51 = vor.u32 1.1754944e-38, %v993_v39  ;;  %vm1002_vm4 = vweird.f32 %v901_v9 }
 0x3e3   :  { %vm1007_vm6 = vcmp.eq.f32.partialorder %v1006_v44, 8.507059e+37 }
 0x3e4   :  { %v985_v30 = vmul.f32 %v2292_v40, %v984_v48  ;;  %v3297_v7 = vmul.f32 %v2318_v29, %v981_v16  ;;  %v2320_v48 = vld [vmem:[%s3549_s1 + $0x20] sm:$0xff] }
 0x3e6   :  { %v986_v5 = vadd.f32 %v2292_v40, %v985_v30  ;;  %2123 = vmatmul.msk.f32.gmra.mxu2 %vm94_vm0, %v3297_v7  ;;  %2155 = vmatmul.msk.f32.gmra.mxu0 %vm94_vm0, %v3297_v7 }
 0x3e7   :  { %v2294_v27 = vpop.eup %2293  ;;  %2171 = vmatmul.msk.f32.gmra.mxu1 %vm94_vm0, %v3297_v7 }
 0x3e8   :  { %v998_v23 = vmul.f32 %v2294_v27, %v901_v9  ;;  %v904_v22 = vpop.f32.mrf.mxu1  ;;  %v990_v42 = vsel %vm989_vm1, %v2292_v40, %v986_v5  ;;  %vm1003_vm3 = vweird.f32 %v2294_v27 }
 0x3e9   :  { %2295 = vrcp.f32 %v904_v22  ;;  %v995_v36 = vsel %vm992_vm2, %v994_v51, %v990_v42  ;;  %vm1004_vm5 = vmor %vm1002_vm4, %vm1003_vm3  ;;  %v1023_v9 = vand.u32 2147483648, %v904_v22  ;;  %v1021_v15 = vand.u32 2147483647, %v904_v22 }
 0x3ea   :  { %v999_v38 = vsub.f32 1.0, %v998_v23  ;;  %v996_v32 = vmul.f32 %v995_v36, %v3191_v25  ;;  %v1009_v25 = vor.u32 1.1754944e-38, %v1008_v10  ;;  %vm1017_vm8 = vweird.f32 %v904_v22 }
 0x3eb   :  { %vm1022_vm10 = vcmp.eq.f32.partialorder %v1021_v15, 8.507059e+37 }
 0x3ec   :  { %v1000_v19 = vmul.f32 %v2294_v27, %v999_v38  ;;  %v3309_v4 = vmul.f32 %v2319_v20, %v996_v32  ;;  %v2321_v38 = vld [vmem:[%s3549_s1 + $0x28] sm:$0xff] }
 0x3ee   :  { %v1001_v26 = vadd.f32 %v2294_v27, %v1000_v19  ;;  %2124 = vmatmul.msk.f32.gmra.mxu2 %vm94_vm0, %v3309_v4  ;;  %2156 = vmatmul.msk.f32.gmra.mxu0 %vm94_vm0, %v3309_v4 }
 0x3ef   :  { %v2296_v6 = vpop.eup %2295  ;;  %2172 = vmatmul.msk.f32.gmra.mxu1 %vm94_vm0, %v3309_v4 }
 0x3f0   :  { %v1013_v21 = vmul.f32 %v2296_v6, %v904_v22  ;;  %v907_v49 = vpop.f32.mrf.mxu1  ;;  %v1005_v50 = vsel %vm1004_vm5, %v2294_v27, %v1001_v26  ;;  %vm1018_vm7 = vweird.f32 %v2296_v6 }
 0x3f1   :  { %2297 = vrcp.f32 %v907_v49  ;;  %v1010_v40 = vsel %vm1007_vm6, %v1009_v25, %v1005_v50  ;;  %vm1019_vm9 = vmor %vm1017_vm8, %vm1018_vm7  ;;  %v1038_v22 = vand.u32 2147483648, %v907_v49  ;;  %v1036_v42 = vand.u32 2147483647, %v907_v49 }
 0x3f2   :  { %v1014_v17 = vsub.f32 1.0, %v1013_v21  ;;  %v1011_v31 = vmul.f32 %v1010_v40, %v3201_v45  ;;  %v1024_v45 = vor.u32 1.1754944e-38, %v1023_v9  ;;  %vm1032_vm12 = vweird.f32 %v907_v49 }
 0x3f3   :  { %vm1037_vm14 = vcmp.eq.f32.partialorder %v1036_v42, 8.507059e+37 }
 0x3f4   :  { %v1015_v13 = vmul.f32 %v2296_v6, %v1014_v17  ;;  %v3321_v35 = vmul.f32 %v2320_v48, %v1011_v31  ;;  %v2322_v17 = vld [vmem:[%s3549_s1 + $0x30] sm:$0xff] }
 0x3f6   :  { %v1016_v16 = vadd.f32 %v2296_v6, %v1015_v13  ;;  %2125 = vmatmul.msk.f32.gmra.mxu2 %vm94_vm0, %v3321_v35  ;;  %2157 = vmatmul.msk.f32.gmra.mxu0 %vm94_vm0, %v3321_v35 }
 0x3f7   :  { %v2298_v30 = vpop.eup %2297  ;;  %2173 = vmatmul.msk.f32.gmra.mxu1 %vm94_vm0, %v3321_v35 }
 0x3f8   :  { %v1028_v39 = vmul.f32 %v2298_v30, %v907_v49  ;;  %v910_v11 = vpop.f32.mrf.mxu1  ;;  %v1020_v29 = vsel %vm1019_vm9, %v2296_v6, %v1016_v16  ;;  %vm1033_vm11 = vweird.f32 %v2298_v30 }
 0x3f9   :  { %2299 = vrcp.f32 %v910_v11  ;;  %v1025_v27 = vsel %vm1022_vm10, %v1024_v45, %v1020_v29  ;;  %vm1034_vm13 = vmor %vm1032_vm12, %vm1033_vm11  ;;  %v1053_v49 = vand.u32 2147483648, %v910_v11  ;;  %v1051_v50 = vand.u32 2147483647, %v910_v11 }
 0x3fa   :  { %v1029_v5 = vsub.f32 1.0, %v1028_v39  ;;  %v1026_v51 = vmul.f32 %v1025_v27, %v3207_v37  ;;  %v1039_v37 = vor.u32 1.1754944e-38, %v1038_v22  ;;  %vm1047_vm1 = vweird.f32 %v910_v11 }
 0x3fb   :  { %vm1052_vm3 = vcmp.eq.f32.partialorder %v1051_v50, 8.507059e+37 }
 0x3fc   :  { %v1030_v23 = vmul.f32 %v2298_v30, %v1029_v5  ;;  %v3333_v36 = vmul.f32 %v2321_v38, %v1026_v51  ;;  %v2323_v5 = vld [vmem:[%s3549_s1 + $0x38] sm:$0xff] }
 0x3fe   :  { %v1031_v32 = vadd.f32 %v2298_v30, %v1030_v23  ;;  %2126 = vmatmul.msk.f32.gmra.mxu2 %vm94_vm0, %v3333_v36  ;;  %2158 = vmatmul.msk.f32.gmra.mxu0 %vm94_vm0, %v3333_v36 }
 0x3ff   :  { %v2300_v19 = vpop.eup %2299  ;;  %2174 = vmatmul.msk.f32.gmra.mxu1 %vm94_vm0, %v3333_v36 }
 0x400   :  { %v1043_v10 = vmul.f32 %v2300_v19, %v910_v11  ;;  %v913_v44 = vpop.f32.mrf.mxu1  ;;  %v1035_v20 = vsel %vm1034_vm13, %v2298_v30, %v1031_v32  ;;  %vm1048_vm15 = vweird.f32 %v2300_v19 }
 0x401   :  { %2301 = vrcp.f32 %v913_v44  ;;  %v1040_v6 = vsel %vm1037_vm14, %v1039_v37, %v1035_v20  ;;  %vm1049_vm2 = vmor %vm1047_vm1, %vm1048_vm15  ;;  %v1068_v11 = vand.u32 2147483648, %v913_v44  ;;  %v1066_v29 = vand.u32 2147483647, %v913_v44 }
 0x402   :  { %v1044_v26 = vsub.f32 1.0, %v1043_v10  ;;  %v1041_v25 = vmul.f32 %v1040_v6, %v3213_v34  ;;  %v1054_v34 = vor.u32 1.1754944e-38, %v1053_v49  ;;  %vm1062_vm5 = vweird.f32 %v913_v44 }
 0x403   :  { %vm1067_vm7 = vcmp.eq.f32.partialorder %v1066_v29, 8.507059e+37 }
 0x404   :  { %v1045_v21 = vmul.f32 %v2300_v19, %v1044_v26  ;;  %v3345_v40 = vmul.f32 %v2322_v17, %v1041_v25  ;;  %v2324_v26 = vld [vmem:[%s3549_s1 + $0x40] sm:$0xff] }
 0x406   :  { %v1046_v31 = vadd.f32 %v2300_v19, %v1045_v21  ;;  %2127 = vmatmul.msk.f32.gmra.mxu2 %vm94_vm0, %v3345_v40  ;;  %2159 = vmatmul.msk.f32.gmra.mxu0 %vm94_vm0, %v3345_v40 }
 0x407   :  { %v2302_v13 = vpop.eup %2301  ;;  %2175 = vmatmul.msk.f32.gmra.mxu1 %vm94_vm0, %v3345_v40 }
 0x408   :  { %v1058_v9 = vmul.f32 %v2302_v13, %v913_v44  ;;  %v916_v15 = vpop.f32.mrf.mxu1  ;;  %v1050_v48 = vsel %vm1049_vm2, %v2300_v19, %v1046_v31  ;;  %vm1063_vm4 = vweird.f32 %v2302_v13 }
 0x409   :  { %2303 = vrcp.f32 %v916_v15  ;;  %v1055_v30 = vsel %vm1052_vm3, %v1054_v34, %v1050_v48  ;;  %vm1064_vm6 = vmor %vm1062_vm5, %vm1063_vm4  ;;  %v1083_v44 = vand.u32 2147483648, %v916_v15  ;;  %v1081_v20 = vand.u32 2147483647, %v916_v15 }
 0x40a   :  { %v1059_v16 = vsub.f32 1.0, %v1058_v9  ;;  %v1056_v45 = vmul.f32 %v1055_v30, %v3219_v14  ;;  %v1069_v14 = vor.u32 1.1754944e-38, %v1068_v11  ;;  %vm1077_vm9 = vweird.f32 %v916_v15 }
 0x40b   :  { %vm1082_vm11 = vcmp.eq.f32.partialorder %v1081_v20, 8.507059e+37 }
 0x40c   :  { %v1060_v39 = vmul.f32 %v2302_v13, %v1059_v16  ;;  %v3357_v27 = vmul.f32 %v2323_v5, %v1056_v45  ;;  %v2325_v16 = vld [vmem:[%s3549_s1 + $0x48] sm:$0xff] }
 0x40e   :  { %v1061_v51 = vadd.f32 %v2302_v13, %v1060_v39  ;;  %2128 = vmatmul.msk.f32.gmra.mxu2 %vm94_vm0, %v3357_v27  ;;  %2160 = vmatmul.msk.f32.gmra.mxu0 %vm94_vm0, %v3357_v27 }
 0x40f   :  { %v2304_v23 = vpop.eup %2303  ;;  %2176 = vmatmul.msk.f32.gmra.mxu1 %vm94_vm0, %v3357_v27 }
 0x410   :  { %v1073_v22 = vmul.f32 %v2304_v23, %v916_v15  ;;  %v919_v42 = vpop.f32.mrf.mxu1  ;;  %v1065_v38 = vsel %vm1064_vm6, %v2302_v13, %v1061_v51  ;;  %vm1078_vm8 = vweird.f32 %v2304_v23 }
 0x411   :  { %2305 = vrcp.f32 %v919_v42  ;;  %v1070_v19 = vsel %vm1067_vm7, %v1069_v14, %v1065_v38  ;;  %vm1079_vm10 = vmor %vm1077_vm9, %vm1078_vm8  ;;  %v1098_v15 = vand.u32 2147483648, %v919_v42  ;;  %v1096_v48 = vand.u32 2147483647, %v919_v42 }
 0x412   :  { %v1074_v32 = vsub.f32 1.0, %v1073_v22  ;;  %v1071_v37 = vmul.f32 %v1070_v19, %v3225_v24  ;;  %v1084_v24 = vor.u32 1.1754944e-38, %v1083_v44  ;;  %vm1092_vm13 = vweird.f32 %v919_v42 }
 0x413   :  { %vm1097_vm15 = vcmp.eq.f32.partialorder %v1096_v48, 8.507059e+37 }
 0x414   :  { %v1075_v10 = vmul.f32 %v2304_v23, %v1074_v32  ;;  %v3369_v6 = vmul.f32 %v2324_v26, %v1071_v37  ;;  %v2326_v32 = vld [vmem:[%s3549_s1 + $0x50] sm:$0xff] }
 0x416   :  { %v1076_v25 = vadd.f32 %v2304_v23, %v1075_v10  ;;  %2129 = vmatmul.msk.f32.gmra.mxu2 %vm94_vm0, %v3369_v6  ;;  %2161 = vmatmul.msk.f32.gmra.mxu0 %vm94_vm0, %v3369_v6 }
 0x417   :  { %v2306_v21 = vpop.eup %2305  ;;  %2177 = vmatmul.msk.f32.gmra.mxu1 %vm94_vm0, %v3369_v6 }
 0x418   :  { %v1088_v49 = vmul.f32 %v2306_v21, %v919_v42  ;;  %v922_v50 = vpop.f32.mrf.mxu1  ;;  %v1080_v17 = vsel %vm1079_vm10, %v2304_v23, %v1076_v25  ;;  %vm1093_vm12 = vweird.f32 %v2306_v21 }
 0x419   :  { %2307 = vrcp.f32 %v922_v50  ;;  %v1085_v13 = vsel %vm1082_vm11, %v1084_v24, %v1080_v17  ;;  %vm1094_vm14 = vmor %vm1092_vm13, %vm1093_vm12  ;;  %v1113_v42 = vand.u32 2147483648, %v922_v50  ;;  %v1111_v38 = vand.u32 2147483647, %v922_v50 }
 0x41a   :  { %v1089_v31 = vsub.f32 1.0, %v1088_v49  ;;  %v1086_v34 = vmul.f32 %v1085_v13, %v3231_v33  ;;  %v1099_v33 = vor.u32 1.1754944e-38, %v1098_v15  ;;  %vm1107_vm2 = vweird.f32 %v922_v50 }
 0x41b   :  { %vm1112_vm4 = vcmp.eq.f32.partialorder %v1111_v38, 8.507059e+37 }
 0x41c   :  { %v1090_v9 = vmul.f32 %v2306_v21, %v1089_v31  ;;  %v3381_v30 = vmul.f32 %v2325_v16, %v1086_v34  ;;  %v2327_v31 = vld [vmem:[%s3549_s1 + $0x58] sm:$0xff] }
 0x41e   :  { %v1091_v45 = vadd.f32 %v2306_v21, %v1090_v9  ;;  %2130 = vmatmul.msk.f32.gmra.mxu2 %vm94_vm0, %v3381_v30  ;;  %2162 = vmatmul.msk.f32.gmra.mxu0 %vm94_vm0, %v3381_v30  ;;  %v1206_v9 = vld [vmem:[%s3556_s8 + $0x68] sm:$0xff] }
 0x41f   :  { %v2308_v39 = vpop.eup %2307  ;;  %2178 = vmatmul.msk.f32.gmra.mxu1 %vm94_vm0, %v3381_v30  ;;  %1334 = vmatpush.msra.mxu3 %v1206_v9 }
 0x420   :  { %v1103_v11 = vmul.f32 %v2308_v39, %v922_v50  ;;  %v925_v29 = vpop.f32.mrf.mxu1  ;;  %v1095_v5 = vsel %vm1094_vm14, %v2306_v21, %v1091_v45  ;;  %vm1108_vm1 = vweird.f32 %v2308_v39 }
 0x421   :  { %2309 = vrcp.f32 %v925_v29  ;;  %v1100_v23 = vsel %vm1097_vm15, %v1099_v33, %v1095_v5  ;;  %vm1109_vm3 = vmor %vm1107_vm2, %vm1108_vm1  ;;  %v1128_v50 = vand.u32 2147483648, %v925_v29  ;;  %v1126_v17 = vand.u32 2147483647, %v925_v29  ;;  %v1198_v33 = vld [vmem:[%s3556_s8 + $0x28] sm:$0xff] }
 0x422   :  { %v1104_v51 = vsub.f32 1.0, %v1103_v11  ;;  %v1101_v14 = vmul.f32 %v1100_v23, %v3237_v46  ;;  %v1114_v46 = vor.u32 1.1754944e-38, %v1113_v42  ;;  %vm1122_vm6 = vweird.f32 %v925_v29  ;;  %v1194_v23 = vld [vmem:[%s3556_s8 + $0x8] sm:$0xff]  ;;  %v2328_v42 = vld [vmem:[%s3549_s1 + $0x60] sm:$0xff] }
 0x423   :  { %v1129_v48 = vor.u32 1.1754944e-38, %v1128_v50  ;;  %vm1127_vm8 = vcmp.eq.f32.partialorder %v1126_v17, 8.507059e+37 }
 0x424   :  { %v1105_v22 = vmul.f32 %v2308_v39, %v1104_v51  ;;  %v3393_v19 = vmul.f32 %v2326_v32, %v1101_v14 }
 0x426   :  { %v1106_v37 = vadd.f32 %v2308_v39, %v1105_v22  ;;  %2131 = vmatmul.msk.f32.gmra.mxu2 %vm94_vm0, %v3393_v19  ;;  %2163 = vmatmul.msk.f32.gmra.mxu0 %vm94_vm0, %v3393_v19 }
 0x427   :  { %v2310_v10 = vpop.eup %2309  ;;  %2179 = vmatmul.msk.f32.gmra.mxu1 %vm94_vm0, %v3393_v19 }
 0x428   :  { %v1118_v44 = vmul.f32 %v2310_v10, %v925_v29  ;;  %v928_v20 = vpop.f32.mrf.mxu1  ;;  %v1110_v26 = vsel %vm1109_vm3, %v2308_v39, %v1106_v37  ;;  %vm1123_vm5 = vweird.f32 %v2310_v10 }
 0x429   :  { %2311 = vrcp.f32 %v928_v20  ;;  %v1115_v21 = vsel %vm1112_vm4, %v1114_v46, %v1110_v26  ;;  %vm1124_vm7 = vmor %vm1122_vm6, %vm1123_vm5  ;;  %v1143_v5 = vand.u32 2147483648, %v928_v20  ;;  %v1141_v22 = vand.u32 2147483647, %v928_v20 }
 0x42a   :  { %v1119_v25 = vsub.f32 1.0, %v1118_v44  ;;  %v1116_v24 = vmul.f32 %v1115_v21, %v3243_v12  ;;  %v1202_v12 = vld [vmem:[%s3556_s8 + $0x48] sm:$0xff]  ;;  %vm1137_vm10 = vweird.f32 %v928_v20 }
 0x42b   :  { %1335 = vmatpush.msra.mxu3 %v1202_v12  ;;  %vm1142_vm12 = vcmp.eq.f32.partialorder %v1141_v22, 8.507059e+37  ;;  %v2330_v12 = vld [vmem:[%s3549_s1 + $0x70] sm:$0xff]  ;;  %v1676_v22 = vld [vmem:[#allocation5 + $0xf8] sm:$0xff] }
 0x42c   :  { %v1120_v49 = vmul.f32 %v2310_v10, %v1119_v25  ;;  %v3405_v13 = vmul.f32 %v2327_v31, %v1116_v24 }
 0x42d   :  { %1336 = vmatpush.msra.mxu3 %v1198_v33 }
 0x42e   :  { %v1121_v34 = vadd.f32 %v2310_v10, %v1120_v49  ;;  %2132 = vmatmul.msk.f32.gmra.mxu2 %vm94_vm0, %v3405_v13  ;;  %2164 = vmatmul.msk.f32.gmra.mxu0 %vm94_vm0, %v3405_v13  ;;  %v2329_v49 = vld [vmem:[%s3549_s1 + $0x68] sm:$0xff] }
 0x42f   :  { %v2312_v15 = vpop.eup %2311  ;;  %2180 = vmatmul.msk.f32.gmra.mxu1 %vm94_vm0, %v3405_v13  ;;  %1337 = vmatpush.msra.mxu3 %v1194_v23 }
 0x430   :  { %v1133_v16 = vmul.f32 %v2312_v15, %v928_v20  ;;  %v931_v45 = vpop.f32.mrf.mxu1  ;;  %v1125_v39 = vsel %vm1124_vm7, %v2310_v10, %v1121_v34  ;;  %vm1138_vm9 = vweird.f32 %v2312_v15 }
 0x431   :  { %2313 = vrcp.f32 %v931_v45  ;;  %v1130_v29 = vsel %vm1127_vm8, %v1129_v48, %v1125_v39  ;;  %vm1139_vm11 = vmor %vm1137_vm10, %vm1138_vm9  ;;  %v1158_v25 = vand.u32 2147483648, %v931_v45  ;;  %v1156_v24 = vand.u32 2147483647, %v931_v45 }
 0x432   :  { %v1134_v11 = vsub.f32 1.0, %v1133_v16  ;;  %v1131_v51 = vmul.f32 %v1130_v29, %v3249_v28  ;;  %v1144_v28 = vor.u32 1.1754944e-38, %v1143_v5  ;;  %vm1152_vm14 = vweird.f32 %v931_v45 }
 0x433   :  { %v1159_v34 = vor.u32 1.1754944e-38, %v1158_v25  ;;  %vm1157_vm1 = vcmp.eq.f32.partialorder %v1156_v24, 8.507059e+37  ;;  %v1519_v25 = vld [vmem:[#allocation2 + $0x10] sm:$0xff] }
 0x434   :  { %v1135_v14 = vmul.f32 %v2312_v15, %v1134_v11  ;;  %v3429_v38 = vmul.f32 %v2328_v42, %v1131_v51 }
 0x436   :  { %v1136_v32 = vadd.f32 %v2312_v15, %v1135_v14  ;;  %2133 = vmatmul.msk.f32.gmra.mxu2 %vm94_vm0, %v3429_v38  ;;  %2165 = vmatmul.msk.f32.gmra.mxu0 %vm94_vm0, %v3429_v38 }
 0x437   :  { %v2314_v37 = vpop.eup %2313  ;;  %2181 = vmatmul.msk.f32.gmra.mxu1 %vm94_vm0, %v3429_v38 }
 0x438   :  { %v1148_v10 = vmul.f32 %v2314_v37, %v931_v45  ;;  %v1140_v46 = vsel %vm1139_vm11, %v2312_v15, %v1136_v32  ;;  %vm1153_vm13 = vweird.f32 %v2314_v37  ;;  %v2331_v32 = vld [vmem:[%s3549_s1 + $0x78] sm:$0xff] }
 0x439   :  { %v1145_v44 = vsel %vm1142_vm12, %v1144_v28, %v1140_v46  ;;  %vm1154_vm15 = vmor %vm1152_vm14, %vm1153_vm13  ;;  %v1675_v28 = vld [vmem:[#allocation5 + $0xf0] sm:$0xff]  ;;  %v1740_v46 = vmul.f32 %v1676_v22, %v2723_v3  ;;  %v1520_v3 = vld [vmem:[#allocation2 + $0x18] sm:$0xff] }
 0x43a   :  { %v1149_v26 = vsub.f32 1.0, %v1148_v10  ;;  %v1146_v20 = vmul.f32 %v1145_v44, %v3255_v41  ;;  %v1674_v44 = vld [vmem:[#allocation5 + $0xe8] sm:$0xff] }
 0x43c   :  { %v1150_v21 = vmul.f32 %v2314_v37, %v1149_v26  ;;  %v3441_v50 = vmul.f32 %v2329_v49, %v1146_v20  ;;  %v1517_v26 = vld [vmem:[#allocation2] sm:$0xff]  ;;  %v1672_v49 = vld [vmem:[#allocation5 + $0xd8] sm:$0xff] }
 0x43d   :  { %v1673_v20 = vld [vmem:[#allocation5 + $0xe0] sm:$0xff] }
 0x43e   :  { %v1151_v17 = vadd.f32 %v2314_v37, %v1150_v21  ;;  %v934_v31 = vpop.f32.mrf.mxu3  ;;  %2134 = vmatmul.msk.f32.gmra.mxu2 %vm94_vm0, %v3441_v50  ;;  %2166 = vmatmul.msk.f32.gmra.mxu0 %vm94_vm0, %v3441_v50  ;;  %v1738_v21 = vmul.f32 %v1674_v44, %v2715_v1  ;;  %v1670_v1 = vld [vmem:[#allocation5 + $0xc8] sm:$0xff] }
 0x43f   :  { %2315 = vrcp.f32 %v934_v31  ;;  %2182 = vmatmul.msk.f32.gmra.mxu1 %vm94_vm0, %v3441_v50  ;;  %v1173_v33 = vand.u32 2147483648, %v934_v31  ;;  %v1171_v11 = vand.u32 2147483647, %v934_v31  ;;  %vm1167_vm3 = vweird.f32 %v934_v31 }
 0x440   :  { %v1155_v41 = vsel %vm1154_vm15, %v2314_v37, %v1151_v17 }
 0x441   :  { %v1160_v9 = vsel %vm1157_vm1, %v1159_v34, %v1155_v41  ;;  %v1174_v5 = vor.u32 1.1754944e-38, %v1173_v33  ;;  %vm1172_vm5 = vcmp.eq.f32.partialorder %v1171_v11, 8.507059e+37  ;;  %v1671_v41 = vld [vmem:[#allocation5 + $0xd0] sm:$0xff]  ;;  %v1521_v33 = vld [vmem:[#allocation2 + $0x20] sm:$0xff]  ;;  %v1524_v11 = vld [vmem:[#allocation2 + $0x38] sm:$0xff] }
 0x442   :  { %v1161_v15 = vmul.f32 %v1160_v9, %v3261_v18 }
 0x444   :  { %v3453_v48 = vmul.f32 %v2330_v12, %v1161_v15 }
 0x445   :  { %v2316_v16 = vpop.eup %2315 }
 0x446   :  { %v1163_v45 = vmul.f32 %v2316_v16, %v934_v31  ;;  %2135 = vmatmul.msk.f32.gmra.mxu2 %vm94_vm0, %v3453_v48  ;;  %2167 = vmatmul.msk.f32.gmra.mxu0 %vm94_vm0, %v3453_v48  ;;  %vm1168_vm2 = vweird.f32 %v2316_v16  ;;  %v1737_v31 = vmul.f32 %v1673_v20, %v2709_v0  ;;  %v1523_v0 = vld [vmem:[#allocation2 + $0x30] sm:$0xff] }
 0x447   :  { %2183 = vmatmul.msk.f32.gmra.mxu1 %vm94_vm0, %v3453_v48  ;;  %vm1169_vm4 = vmor %vm1167_vm3, %vm1168_vm2 }
 0x448   :  { %v1164_v39 = vsub.f32 1.0, %v1163_v45  ;;  %v1669_v45 = vld [vmem:[#allocation5 + $0xc0] sm:$0xff] }
 0x44a   :  { %v1165_v18 = vmul.f32 %v2316_v16, %v1164_v39  ;;  %v1734_v39 = vmul.f32 %v1670_v1, %v2701_v62  ;;  %v1666_v62 = vld [vmem:[#allocation5 + $0xa8] sm:$0xff]  ;;  %v1535_v1 = vld [vmem:[#allocation2 + $0x90] sm:$0xff] }
 0x44c   :  { %v1166_v29 = vadd.f32 %v2316_v16, %v1165_v18  ;;  %v1668_v18 = vld [vmem:[#allocation5 + $0xb8] sm:$0xff] }
 0x44e   :  { %v1170_v51 = vsel %vm1169_vm4, %v2316_v16, %v1166_v29  ;;  %v1735_v16 = vmul.f32 %v1671_v41, %v2699_v61 }
 0x44f   :  { %v1175_v23 = vsel %vm1172_vm5, %v1174_v5, %v1170_v51  ;;  %v1667_v5 = vld [vmem:[#allocation5 + $0xb0] sm:$0xff] }
 0x450   :  { %v1176_v14 = vmul.f32 %v1175_v23, %v3267_v8  ;;  %v1739_v8 = vmul.f32 %v1675_v28, %v2719_v2  ;;  %v1736_v2 = vmul.f32 %v1672_v49, %v2705_v63  ;;  %v1733_v63 = vmul.f32 %v1669_v45, %v2695_v60  ;;  %v1665_v60 = vld [vmem:[#allocation5 + $0xa0] sm:$0xff]  ;;  %v1531_v49 = vld [vmem:[#allocation2 + $0x70] sm:$0xff] }
 0x451   :  { %v1732_v23 = vmul.f32 %v1668_v18, %v2691_v59  ;;  %v1730_v28 = vmul.f32 %v1666_v62, %v2683_v57  ;;  %v1664_v59 = vld [vmem:[#allocation5 + $0x98] sm:$0xff]  ;;  %v1729_v44 = vmul.f32 %v1665_v60, %v2679_v56  ;;  %v1662_v57 = vld [vmem:[#allocation5 + $0x88] sm:$0xff]  ;;  %v1661_v56 = vld [vmem:[#allocation5 + $0x80] sm:$0xff] }
 0x452   :  { %v3465_v37 = vmul.f32 %v2331_v32, %v1176_v14  ;;  %v1527_v32 = vld [vmem:[#allocation2 + $0x50] sm:$0xff]  ;;  %v1537_v18 = vld [vmem:[#allocation2 + $0xa0] sm:$0xff] }
 0x453   :  { %v1404_v42 = vpop.f32.mrf.mxu0 }
 0x454   :  { %v1469_v10 = vpop.f32.mrf.mxu1  ;;  %2136 = vmatmul.msk.f32.vlgmr.msrb.gmra.mxu3 %vm94_vm0, %v3465_v37  ;;  %2168 = vmatmul.msk.f32.gmra.mxu0 %vm94_vm0, %v3465_v37  ;;  %v1583_v34 = vmul.f32 %v1519_v25, %v1404_v42  ;;  %v1731_v42 = vmul.f32 %v1667_v5, %v2687_v58  ;;  %v1728_v25 = vmul.f32 %v1664_v59, %v2675_v55  ;;  %v1532_v55 = vld [vmem:[#allocation2 + $0x78] sm:$0xff] }
 0x455   :  { %2184 = vmatmul.msk.f32.gmra.mxu1 %vm94_vm0, %v3465_v37  ;;  %1842 = vmatpush.msrb.mxu3 %v1740_v46  ;;  %v1584_v9 = vmul.f32 %v1520_v3, %v1469_v10  ;;  %v1525_v10 = vld [vmem:[#allocation2 + $0x40] sm:$0xff]  ;;  %v1528_v46 = vld [vmem:[#allocation2 + $0x58] sm:$0xff] }
 0x456   :  { %v1548_v59 = vld [vmem:[#allocation2 + $0xf8] sm:$0xff] }
 0x457   :  { %1843 = vmatpush.msrb.mxu3 %v1739_v8 }
 0x459   :  { %v1274_v24 = vpop.f32.mrf.mxu2  ;;  %1844 = vmatpush.msrb.mxu3 %v1738_v21 }
 0x45a   :  { %v1581_v17 = vmul.f32 %v1517_v26, %v1274_v24  ;;  %v1663_v26 = vld [vmem:[#allocation5 + $0x90] sm:$0xff] }
 0x45b   :  { %1845 = vmatpush.msrb.mxu3 %v1737_v31  ;;  %v1407_v15 = vpop.f32.mrf.mxu0  ;;  %v1727_v24 = vmul.f32 %v1663_v26, %v2671_v54  ;;  %v1529_v31 = vld [vmem:[#allocation2 + $0x60] sm:$0xff] }
 0x45c   :  { %1793 = vmatmul.f32.vlgmr.msrb.gmra.mxu2 %v1581_v17  ;;  %2137 = vmatmul.msk.f32.vlgmr.msra.gmra.mxu3 %vm94_vm0, %v3273_v43  ;;  %v1472_v12 = vpop.f32.mrf.mxu1  ;;  %v1587_v29 = vmul.f32 %v1523_v0, %v1407_v15  ;;  %v1726_v17 = vmul.f32 %v1662_v57, %v2667_v53  ;;  %v1533_v53 = vld [vmem:[#allocation2 + $0x80] sm:$0xff] }
 0x45d   :  { %1923 = vmatmul.f32.vlgmr.msrb.gmra.mxu0 %v1583_v34  ;;  %1846 = vmatpush.msrb.mxu3 %v1736_v2  ;;  %v1588_v14 = vmul.f32 %v1524_v11, %v1472_v12  ;;  %v1725_v34 = vmul.f32 %v1661_v56, %v2663_v52  ;;  %v1536_v12 = vld [vmem:[#allocation2 + $0x98] sm:$0xff] }
 0x45e   :  { %1988 = vmatmul.f32.vlgmr.msrb.gmra.mxu1 %v1584_v9  ;;  %v1540_v11 = vld [vmem:[#allocation2 + $0xb8] sm:$0xff] }
 0x45f   :  { %1847 = vmatpush.msrb.mxu3 %v1735_v16 }
 0x461   :  { %1848 = vmatpush.msrb.mxu3 %v1734_v39  ;;  %v1277_v43 = vpop.f32.mrf.mxu2 }
 0x462   :  { %v1585_v51 = vmul.f32 %v1521_v33, %v1277_v43 }
 0x463   :  { %1849 = vmatpush.msrb.mxu3 %v1733_v63  ;;  %v1410_v61 = vpop.f32.mrf.mxu0 }
 0x464   :  { %2138 = vmatmul.msk.f32.gmra.mxu3 %vm94_vm0, %v3285_v47  ;;  %v1475_v22 = vpop.f32.mrf.mxu1  ;;  %1796 = vmatmul.f32.gmra.mxu2 %v1585_v51  ;;  %v1591_v47 = vmul.f32 %v1527_v32, %v1410_v61  ;;  %v1544_v61 = vld [vmem:[#allocation2 + $0xd8] sm:$0xff] }
 0x465   :  { %1926 = vmatmul.f32.gmra.mxu0 %v1587_v29  ;;  %1850 = vmatpush.msrb.mxu3 %v1732_v23  ;;  %v1592_v58 = vmul.f32 %v1528_v46, %v1475_v22 }
 0x466   :  { %1991 = vmatmul.f32.gmra.mxu1 %v1588_v14  ;;  %v1541_v14 = vld [vmem:[#allocation2 + $0xc0] sm:$0xff] }
 0x467   :  { %1851 = vmatpush.msrb.mxu3 %v1731_v42 }
 0x469   :  { %1852 = vmatpush.msrb.mxu3 %v1730_v28  ;;  %v1280_v8 = vpop.f32.mrf.mxu2 }
 0x46a   :  { %v1589_v20 = vmul.f32 %v1525_v10, %v1280_v8  ;;  %v1545_v10 = vld [vmem:[#allocation2 + $0xe0] sm:$0xff] }
 0x46b   :  { %1853 = vmatpush.msrb.mxu3 %v1729_v44  ;;  %v1413_v21 = vpop.f32.mrf.mxu0 }
 0x46c   :  { %2139 = vmatmul.msk.f32.gmra.mxu3 %vm94_vm0, %v3297_v7  ;;  %v1478_v3 = vpop.f32.mrf.mxu1  ;;  %1799 = vmatmul.f32.gmra.mxu2 %v1589_v20  ;;  %v1595_v41 = vmul.f32 %v1531_v49, %v1413_v21 }
 0x46d   :  { %1929 = vmatmul.f32.gmra.mxu0 %v1591_v47  ;;  %1854 = vmatpush.msrb.mxu3 %v1728_v25  ;;  %v1596_v2 = vmul.f32 %v1532_v55, %v1478_v3  ;;  %v1549_v25 = vld [vmem:[#allocation2 + $0x100] sm:$0xff] }
 0x46e   :  { %1994 = vmatmul.f32.gmra.mxu1 %v1592_v58  ;;  %v1552_v58 = vld [vmem:[#allocation2 + $0x118] sm:$0xff] }
 0x46f   :  { %1855 = vmatpush.msrb.mxu3 %v1727_v24 }
 0x471   :  { %1856 = vmatpush.msrb.mxu3 %v1726_v17  ;;  %v1283_v7 = vpop.f32.mrf.mxu2  ;;  %v1553_v17 = vld [vmem:[#allocation2 + $0x120] sm:$0xff] }
 0x472   :  { %v1593_v9 = vmul.f32 %v1529_v31, %v1283_v7  ;;  %v1556_v31 = vld [vmem:[#allocation2 + $0x138] sm:$0xff] }
 0x473   :  { %1857 = vmatpush.msrb.mxu3 %v1725_v34  ;;  %v1416_v15 = vpop.f32.mrf.mxu0 }
 0x474   :  { %2140 = vmatmul.msk.f32.gmra.mxu3 %vm94_vm0, %v3309_v4  ;;  %v1481_v54 = vpop.f32.mrf.mxu1  ;;  %1802 = vmatmul.f32.gmra.mxu2 %v1593_v9  ;;  %v1599_v16 = vmul.f32 %v1535_v1, %v1416_v15  ;;  %v1539_v4 = vld [vmem:[#allocation2 + $0xb0] sm:$0xff]  ;;  %v1557_v15 = vld [vmem:[#allocation2 + $0x140] sm:$0xff] }
 0x475   :  { %1932 = vmatmul.f32.gmra.mxu0 %v1595_v41  ;;  %v1600_v52 = vmul.f32 %v1536_v12, %v1481_v54  ;;  %v1560_v54 = vld [vmem:[#allocation2 + $0x158] sm:$0xff] }
 0x476   :  { %1997 = vmatmul.f32.gmra.mxu1 %v1596_v2 }
 0x479   :  { %v1286_v45 = vpop.f32.mrf.mxu2 }
 0x47a   :  { %v1597_v0 = vmul.f32 %v1533_v53, %v1286_v45 }
 0x47b   :  { %v1419_v39 = vpop.f32.mrf.mxu0 }
 0x47c   :  { %2141 = vmatmul.msk.f32.gmra.mxu3 %vm94_vm0, %v3321_v35  ;;  %v1484_v33 = vpop.f32.mrf.mxu1  ;;  %1805 = vmatmul.f32.gmra.mxu2 %v1597_v0  ;;  %v1603_v63 = vmul.f32 %v1539_v4, %v1419_v39  ;;  %v1543_v35 = vld [vmem:[#allocation2 + $0xd0] sm:$0xff]  ;;  %v1564_v39 = vld [vmem:[#allocation2 + $0x178] sm:$0xff] }
 0x47d   :  { %1935 = vmatmul.f32.gmra.mxu0 %v1599_v16  ;;  %v1604_v5 = vmul.f32 %v1540_v11, %v1484_v33 }
 0x47e   :  { %2000 = vmatmul.f32.gmra.mxu1 %v1600_v52  ;;  %v1561_v52 = vld [vmem:[#allocation2 + $0x160] sm:$0xff] }
 0x481   :  { %v1289_v29 = vpop.f32.mrf.mxu2 }
 0x482   :  { %v1601_v43 = vmul.f32 %v1537_v18, %v1289_v29 }
 0x483   :  { %v1422_v51 = vpop.f32.mrf.mxu0 }
 0x484   :  { %2142 = vmatmul.msk.f32.gmra.mxu3 %vm94_vm0, %v3333_v36  ;;  %v1487_v23 = vpop.f32.mrf.mxu1  ;;  %1808 = vmatmul.f32.gmra.mxu2 %v1601_v43  ;;  %v1607_v62 = vmul.f32 %v1543_v35, %v1422_v51  ;;  %v1547_v36 = vld [vmem:[#allocation2 + $0xf0] sm:$0xff]  ;;  %v1565_v43 = vld [vmem:[#allocation2 + $0x180] sm:$0xff] }
 0x485   :  { %1938 = vmatmul.f32.gmra.mxu0 %v1603_v63  ;;  %v1608_v60 = vmul.f32 %v1544_v61, %v1487_v23 }
 0x486   :  { %2003 = vmatmul.f32.gmra.mxu1 %v1604_v5  ;;  %v1568_v5 = vld [vmem:[#allocation2 + $0x198] sm:$0xff] }
 0x489   :  { %v1292_v22 = vpop.f32.mrf.mxu2 }
 0x48a   :  { %v1605_v42 = vmul.f32 %v1541_v14, %v1292_v22  ;;  %v1569_v22 = vld [vmem:[#allocation2 + $0x1a0] sm:$0xff] }
 0x48b   :  { %v1425_v32 = vpop.f32.mrf.mxu0 }
 0x48c   :  { %2143 = vmatmul.msk.f32.gmra.mxu3 %vm94_vm0, %v3345_v40  ;;  %v1490_v28 = vpop.f32.mrf.mxu1  ;;  %1811 = vmatmul.f32.gmra.mxu2 %v1605_v42  ;;  %v1611_v46 = vmul.f32 %v1547_v36, %v1425_v32  ;;  %v1551_v40 = vld [vmem:[#allocation2 + $0x110] sm:$0xff]  ;;  %v1572_v42 = vld [vmem:[#allocation2 + $0x1b8] sm:$0xff] }
 0x48d   :  { %1941 = vmatmul.f32.gmra.mxu0 %v1607_v62  ;;  %v1612_v8 = vmul.f32 %v1548_v59, %v1490_v28  ;;  %v1571_v62 = vld [vmem:[#allocation2 + $0x1b0] sm:$0xff]  ;;  %v1573_v59 = vld [vmem:[#allocation2 + $0x1c0] sm:$0xff] }
 0x48e   :  { %2006 = vmatmul.f32.gmra.mxu1 %v1608_v60 }
 0x491   :  { %v1295_v44 = vpop.f32.mrf.mxu2 }
 0x492   :  { %v1609_v47 = vmul.f32 %v1545_v10, %v1295_v44  ;;  %v1576_v44 = vld [vmem:[#allocation2 + $0x1d8] sm:$0xff] }
 0x493   :  { %v1428_v26 = vpop.f32.mrf.mxu0 }
 0x494   :  { %2144 = vmatmul.msk.f32.gmra.mxu3 %vm94_vm0, %v3357_v27  ;;  %v1493_v20 = vpop.f32.mrf.mxu1  ;;  %1814 = vmatmul.f32.gmra.mxu2 %v1609_v47  ;;  %v1615_v21 = vmul.f32 %v1551_v40, %v1428_v26  ;;  %v1555_v27 = vld [vmem:[#allocation2 + $0x130] sm:$0xff] }
 0x495   :  { %1944 = vmatmul.f32.gmra.mxu0 %v1611_v46  ;;  %v1616_v24 = vmul.f32 %v1552_v58, %v1493_v20  ;;  %v1579_v40 = vld [vmem:[#allocation2 + $0x1f0] sm:$0xff] }
 0x496   :  { %2009 = vmatmul.f32.gmra.mxu1 %v1612_v8 }
 0x499   :  { %v1298_v57 = vpop.f32.mrf.mxu2 }
 0x49a   :  { %v1613_v3 = vmul.f32 %v1549_v25, %v1298_v57 }
 0x49b   :  { %v1431_v56 = vpop.f32.mrf.mxu0 }
 0x49c   :  { %2145 = vmatmul.msk.f32.gmra.mxu3 %vm94_vm0, %v3369_v6  ;;  %v1496_v49 = vpop.f32.mrf.mxu1  ;;  %1817 = vmatmul.f32.gmra.mxu2 %v1613_v3  ;;  %v1619_v55 = vmul.f32 %v1555_v27, %v1431_v56  ;;  %v1559_v6 = vld [vmem:[#allocation2 + $0x150] sm:$0xff]  ;;  %v1577_v3 = vld [vmem:[#allocation2 + $0x1e0] sm:$0xff] }
 0x49d   :  { %1947 = vmatmul.f32.gmra.mxu0 %v1615_v21  ;;  %v1620_v7 = vmul.f32 %v1556_v31, %v1496_v49  ;;  %v1518_v49 = vld [vmem:[#allocation2 + $0x8] sm:$0xff] }
 0x49e   :  { %2012 = vmatmul.f32.gmra.mxu1 %v1616_v24 }
 0x4a1   :  { %v1301_v34 = vpop.f32.mrf.mxu2 }
 0x4a2   :  { %v1617_v41 = vmul.f32 %v1553_v17, %v1301_v34  ;;  %v1522_v17 = vld [vmem:[#allocation2 + $0x28] sm:$0xff] }
 0x4a3   :  { %v1434_v9 = vpop.f32.mrf.mxu0  ;;  %v1526_v34 = vld [vmem:[#allocation2 + $0x48] sm:$0xff] }
 0x4a4   :  { %2146 = vmatmul.msk.f32.gmra.mxu3 %vm94_vm0, %v3381_v30  ;;  %v1499_v2 = vpop.f32.mrf.mxu1  ;;  %1820 = vmatmul.f32.gmra.mxu2 %v1617_v41  ;;  %v1623_v1 = vmul.f32 %v1559_v6, %v1434_v9  ;;  %v1563_v30 = vld [vmem:[#allocation2 + $0x170] sm:$0xff]  ;;  %v1530_v9 = vld [vmem:[#allocation2 + $0x68] sm:$0xff] }
 0x4a5   :  { %1950 = vmatmul.f32.gmra.mxu0 %v1619_v55  ;;  %v1624_v16 = vmul.f32 %v1560_v54, %v1499_v2  ;;  %v1534_v6 = vld [vmem:[#allocation2 + $0x88] sm:$0xff] }
 0x4a6   :  { %2015 = vmatmul.f32.gmra.mxu1 %v1620_v7 }
 0x4a9   :  { %v1304_v53 = vpop.f32.mrf.mxu2 }
 0x4aa   :  { %v1621_v12 = vmul.f32 %v1557_v15, %v1304_v53 }
 0x4ab   :  { %v1437_v45 = vpop.f32.mrf.mxu0 }
 0x4ac   :  { %2147 = vmatmul.msk.f32.gmra.mxu3 %vm94_vm0, %v3393_v19  ;;  %v1502_v0 = vpop.f32.mrf.mxu1  ;;  %1823 = vmatmul.f32.gmra.mxu2 %v1621_v12  ;;  %v1627_v33 = vmul.f32 %v1563_v30, %v1437_v45  ;;  %v1567_v19 = vld [vmem:[#allocation2 + $0x190] sm:$0xff]  ;;  %v1546_v30 = vld [vmem:[#allocation2 + $0xe8] sm:$0xff] }
 0x4ad   :  { %1953 = vmatmul.f32.gmra.mxu0 %v1623_v1  ;;  %v1628_v11 = vmul.f32 %v1564_v39, %v1502_v0  ;;  %v1538_v1 = vld [vmem:[#allocation2 + $0xa8] sm:$0xff] }
 0x4ae   :  { %2018 = vmatmul.f32.gmra.mxu1 %v1624_v16  ;;  %v1542_v16 = vld [vmem:[#allocation2 + $0xc8] sm:$0xff] }
 0x4b1   :  { %v1307_v4 = vpop.f32.mrf.mxu2 }
 0x4b2   :  { %v1625_v18 = vmul.f32 %v1561_v52, %v1307_v4 }
 0x4b3   :  { %v1440_v63 = vpop.f32.mrf.mxu0 }
 0x4b4   :  { %2148 = vmatmul.msk.f32.gmra.mxu3 %vm94_vm0, %v3405_v13  ;;  %v1505_v29 = vpop.f32.mrf.mxu1  ;;  %1826 = vmatmul.f32.gmra.mxu2 %v1625_v18  ;;  %v1631_v51 = vmul.f32 %v1567_v19, %v1440_v63  ;;  %v1558_v19 = vld [vmem:[#allocation2 + $0x148] sm:$0xff] }
 0x4b5   :  { %1956 = vmatmul.f32.gmra.mxu0 %v1627_v33  ;;  %v1632_v14 = vmul.f32 %v1568_v5, %v1505_v29  ;;  %v1550_v33 = vld [vmem:[#allocation2 + $0x108] sm:$0xff] }
 0x4b6   :  { %2021 = vmatmul.f32.gmra.mxu1 %v1628_v11  ;;  %v1554_v11 = vld [vmem:[#allocation2 + $0x128] sm:$0xff] }
 0x4b9   :  { %v1310_v23 = vpop.f32.mrf.mxu2 }
 0x4ba   :  { %v1629_v35 = vmul.f32 %v1565_v43, %v1310_v23 }
 0x4bb   :  { %v1443_v61 = vpop.f32.mrf.mxu0 }
 0x4bc   :  { %2149 = vmatmul.msk.f32.gmra.mxu3 %vm94_vm0, %v3429_v38  ;;  %1829 = vmatmul.f32.gmra.mxu2 %v1629_v35  ;;  %v1508_v13 = vpop.f32.mrf.mxu1  ;;  %v1635_v60 = vmul.f32 %v1571_v62, %v1443_v61  ;;  %v1575_v38 = vld [vmem:[#allocation2 + $0x1d0] sm:$0xff] }
 0x4bd   :  { %1959 = vmatmul.f32.gmra.mxu0 %v1631_v51  ;;  %v1636_v36 = vmul.f32 %v1572_v42, %v1508_v13  ;;  %v1562_v51 = vld [vmem:[#allocation2 + $0x168] sm:$0xff] }
 0x4be   :  { %2024 = vmatmul.f32.gmra.mxu1 %v1632_v14  ;;  %v1566_v14 = vld [vmem:[#allocation2 + $0x188] sm:$0xff] }
 0x4c1   :  { %v1313_v32 = vpop.f32.mrf.mxu2 }
 0x4c2   :  { %v1633_v28 = vmul.f32 %v1569_v22, %v1313_v32  ;;  %v1570_v22 = vld [vmem:[#allocation2 + $0x1a8] sm:$0xff] }
 0x4c3   :  { %v1446_v10 = vpop.f32.mrf.mxu0 }
 0x4c4   :  { %2150 = vmatmul.msk.f32.gmra.mxu3 %vm94_vm0, %v3441_v50  ;;  %1832 = vmatmul.f32.gmra.mxu2 %v1633_v28  ;;  %v1511_v46 = vpop.f32.mrf.mxu1  ;;  %v1639_v47 = vmul.f32 %v1575_v38, %v1446_v10  ;;  %v1580_v50 = vld [vmem:[#allocation2 + $0x1f8] sm:$0xff] }
 0x4c5   :  { %1962 = vmatmul.f32.gmra.mxu0 %v1635_v60  ;;  %v1640_v20 = vmul.f32 %v1576_v44, %v1511_v46 }
 0x4c6   :  { %2027 = vmatmul.f32.gmra.mxu1 %v1636_v36  ;;  %v1574_v36 = vld [vmem:[#allocation2 + $0x1c8] sm:$0xff] }
 0x4c9   :  { %v1316_v8 = vpop.f32.mrf.mxu2 }
 0x4ca   :  { %v1637_v26 = vmul.f32 %v1573_v59, %v1316_v8 }
 0x4cc   :  { %2151 = vmatmul.msk.f32.gmra.mxu3 %vm94_vm0, %v3453_v48  ;;  %1835 = vmatmul.f32.gmra.mxu2 %v1637_v26 }
 0x4cd   :  { %1965 = vmatmul.f32.gmra.mxu0 %v1639_v47  ;;  %v1578_v47 = vld [vmem:[#allocation2 + $0x1e8] sm:$0xff] }
 0x4ce   :  { %2030 = vmatmul.f32.gmra.mxu1 %v1640_v20 }
 0x4d1   :  { %v1449_v25 = vpop.f32.mrf.mxu0 }
 0x4d2   :  { %v1643_v58 = vmul.f32 %v1579_v40, %v1449_v25  ;;  %v1514_v21 = vpop.f32.mrf.mxu1  ;;  %v3524_v25 = vld [vmem:[%s3559_s11] ss:$0 sm:$0xff]  ;;  %s2416_s11 = smov [#allocation7]  }
 0x4d3   :  { %v1644_v57 = vmul.f32 %v1580_v50, %v1514_v21  ;;  %s2057_s23 = sshll.u32 %s2416_s11, 4  ;;  %s2058_s23 = int_to_ptr.vmem [resolvable:$true] %s2057_s23 }
 0x4d4   :  { %2152 = vmatmul.msk.f32.gmra.mxu3 %vm94_vm0, %v3465_v37 }
 0x4d5   :  { %1968 = vmatmul.f32.gmra.mxu0 %v1643_v58 }
 0x4d6   :  { %2033 = vmatmul.f32.gmra.mxu1 %v1644_v57 }
 0x4d7   :  { %v1319_v24 = vpop.f32.mrf.mxu3 }
 0x4d8   :  { %v1641_v56 = vmul.f32 %v1577_v3, %v1319_v24 }
 0x4da   :  { %1838 = vmatmul.f32.gmra.mxu2 %v1641_v56  ;;  %v1924_v32 = vpop.f32.mrf.mxu0 }
 0x4db   :  { %v1989_v28 = vpop.f32.mrf.mxu1 }
 0x4df   :  { %v1339_v48 = vpop.f32.mrf.mxu3  ;;  %v1794_v13 = vpop.f32.mrf.mxu2 }
 0x4e0   :  { %v1582_v27 = vmul.f32 %v1518_v49, %v1339_v48  ;;  %v1795_v21 = vadd.f32 %v3524_v25, %v1794_v13 }
 0x4e2   :  { %1858 = vmatmul.f32.vlgmr.msrb.gmra.mxu3 %v1582_v27  ;;  %v1927_v46 = vpop.f32.mrf.mxu0 }
 0x4e3   :  { %v1992_v44 = vpop.f32.mrf.mxu1 }
 0x4e7   :  { %v1342_v31 = vpop.f32.mrf.mxu3  ;;  %v1797_v10 = vpop.f32.mrf.mxu2 }
 0x4e8   :  { %v1586_v55 = vmul.f32 %v1522_v17, %v1342_v31  ;;  %v1798_v27 = vadd.f32 %v3524_v25, %v1797_v10 }
 0x4ea   :  { %1861 = vmatmul.f32.gmra.mxu3 %v1586_v55  ;;  %v1930_v40 = vpop.f32.mrf.mxu0 }
 0x4eb   :  { %v1995_v50 = vpop.f32.mrf.mxu1 }
 0x4ef   :  { %v1345_v41 = vpop.f32.mrf.mxu3  ;;  %v1800_v20 = vpop.f32.mrf.mxu2 }
 0x4f0   :  { %v1590_v7 = vmul.f32 %v1526_v34, %v1345_v41 }
 0x4f2   :  { %1864 = vmatmul.f32.gmra.mxu3 %v1590_v7  ;;  %v1933_v24 = vpop.f32.mrf.mxu0 }
 0x4f3   :  { %v1998_v49 = vpop.f32.mrf.mxu1 }
 0x4f7   :  { %v1348_v37 = vpop.f32.mrf.mxu3  ;;  %v1803_v58 = vpop.f32.mrf.mxu2 }
 0x4f8   :  { %v1594_v2 = vmul.f32 %v1530_v9, %v1348_v37  ;;  %v1801_v37 = vadd.f32 %v3524_v25, %v1800_v20 }
 0x4fa   :  { %1867 = vmatmul.f32.gmra.mxu3 %v1594_v2  ;;  %v1936_v41 = vpop.f32.mrf.mxu0 }
 0x4fb   :  { %v2001_v9 = vpop.f32.mrf.mxu1 }
 0x4ff   :  { %v1351_v15 = vpop.f32.mrf.mxu3  ;;  %v1806_v17 = vpop.f32.mrf.mxu2 }
 0x500   :  { %v1598_v54 = vmul.f32 %v1534_v6, %v1351_v15 }
 0x502   :  { %1870 = vmatmul.f32.gmra.mxu3 %v1598_v54 }
 0x507   :  { %v1354_v53 = vpop.f32.mrf.mxu3  ;;  %v1809_v15 = vpop.f32.mrf.mxu2 }
 0x508   :  { %v1602_v12 = vmul.f32 %v1538_v1, %v1354_v53  ;;  %v1939_v53 = vpop.f32.mrf.mxu0 }
 0x50a   :  { %1873 = vmatmul.f32.gmra.mxu3 %v1602_v12  ;;  %v1804_v12 = vadd.f32 %v3524_v25, %v1803_v58 }
 0x50f   :  { %v1357_v45 = vpop.f32.mrf.mxu3 }
 0x510   :  { %v1606_v0 = vmul.f32 %v1542_v16, %v1357_v45  ;;  %v2004_v16 = vpop.f32.mrf.mxu1 }
 0x512   :  { %1876 = vmatmul.f32.gmra.mxu3 %v1606_v0 }
 0x517   :  { %v1360_v52 = vpop.f32.mrf.mxu3 }
 0x518   :  { %v1610_v39 = vmul.f32 %v1546_v30, %v1360_v52  ;;  %v1812_v52 = vpop.f32.mrf.mxu2 }
 0x519   :  { %v1813_v13 = vadd.f32 %v3524_v25, %v1812_v52 }
 0x51a   :  { %1879 = vmatmul.f32.gmra.mxu3 %v1610_v39 }
 0x51f   :  { %v1363_v4 = vpop.f32.mrf.mxu3 }
 0x520   :  { %v1614_v18 = vmul.f32 %v1550_v33, %v1363_v4  ;;  %v1807_v33 = vadd.f32 %v3524_v25, %v1806_v17  ;;  %v1942_v4 = vpop.f32.mrf.mxu0 }
 0x522   :  { %1882 = vmatmul.f32.gmra.mxu3 %v1614_v18 }
 0x527   :  { %v1366_v63 = vpop.f32.mrf.mxu3 }
 0x528   :  { %v1618_v29 = vmul.f32 %v1554_v11, %v1366_v63  ;;  %v2007_v63 = vpop.f32.mrf.mxu1 }
 0x52a   :  { %1885 = vmatmul.f32.gmra.mxu3 %v1618_v29 }
 0x52f   :  { %v1369_v43 = vpop.f32.mrf.mxu3 }
 0x530   :  { %v1622_v5 = vmul.f32 %v1558_v19, %v1369_v43  ;;  %v1815_v43 = vpop.f32.mrf.mxu2 }
 0x532   :  { %1888 = vmatmul.f32.gmra.mxu3 %v1622_v5  ;;  %v1810_v5 = vadd.f32 %v3524_v25, %v1809_v15 }
 0x537   :  { %v1372_v23 = vpop.f32.mrf.mxu3 }
 0x538   :  { %v1626_v35 = vmul.f32 %v1562_v51, %v1372_v23 }
 0x53a   :  { %1891 = vmatmul.f32.gmra.mxu3 %v1626_v35  ;;  %v1945_v35 = vpop.f32.mrf.mxu0 }
 0x53f   :  { %v1375_v61 = vpop.f32.mrf.mxu3 }
 0x540   :  { %v1630_v62 = vmul.f32 %v1566_v14, %v1375_v61  ;;  %v2010_v61 = vpop.f32.mrf.mxu1 }
 0x542   :  { %1894 = vmatmul.f32.gmra.mxu3 %v1630_v62 }
 0x547   :  { %v1378_v42 = vpop.f32.mrf.mxu3 }
 0x548   :  { %v1634_v60 = vmul.f32 %v1570_v22, %v1378_v42  ;;  %v1818_v22 = vpop.f32.mrf.mxu2  ;;  %v2013_v10 = vpop.f32.mrf.mxu1 }
 0x549   :  { %v1819_v20 = vadd.f32 %v3524_v25, %v1818_v22 }
 0x54a   :  { %1897 = vmatmul.f32.gmra.mxu3 %v1634_v60 }
 0x54f   :  { %v1381_v38 = vpop.f32.mrf.mxu3 }
 0x550   :  { %v1638_v59 = vmul.f32 %v1574_v36, %v1381_v38  ;;  %v1816_v38 = vadd.f32 %v3524_v25, %v1815_v43 }
 0x552   :  { %1900 = vmatmul.f32.gmra.mxu3 %v1638_v59 }
 0x557   :  { %v1384_v8 = vpop.f32.mrf.mxu3 }
 0x558   :  { %v1642_v26 = vmul.f32 %v1578_v47, %v1384_v8 }
 0x55a   :  { %1903 = vmatmul.f32.gmra.mxu3 %v1642_v26 }
 0x565   :  { %v1859_v57 = vpop.f32.mrf.mxu3 }
 0x566   :  { %v1860_v3 = vadd.f32 %v1859_v57, %v1795_v21 }
 0x568   :  { %v1925_v56 = vadd.f32 %v1924_v32, %v1860_v3 }
 0x56a   :  { %v1990_v48 = vadd.f32 %v1989_v28, %v1925_v56  ;;  %v1948_v28 = vpop.f32.mrf.mxu0 }
 0x56c   :  { %2037 = vst [vmem:[#allocation7] sm:$0xff] %v1990_v48 }
 0x56d   :  { %v1862_v31 = vpop.f32.mrf.mxu3 }
 0x56e   :  { %v1863_v55 = vadd.f32 %v1862_v31, %v1798_v27 }
 0x570   :  { %v1928_v34 = vadd.f32 %v1927_v46, %v1863_v55 }
 0x572   :  { %v1993_v7 = vadd.f32 %v1992_v44, %v1928_v34  ;;  %v1821_v44 = vpop.f32.mrf.mxu2  ;;  %v1951_v26 = vpop.f32.mrf.mxu0 }
 0x574   :  { %2038 = vst [vmem:[#allocation7 + $0x8] sm:$0xff] %v1993_v7 }
 0x575   :  { %v1865_v2 = vpop.f32.mrf.mxu3 }
 0x576   :  { %v1866_v6 = vadd.f32 %v1865_v2, %v1801_v37 }
 0x578   :  { %v1931_v54 = vadd.f32 %v1930_v40, %v1866_v6  ;;  %v2016_v40 = vpop.f32.mrf.mxu1 }
 0x57a   :  { %v1996_v1 = vadd.f32 %v1995_v50, %v1931_v54  ;;  %v1824_v57 = vpop.f32.mrf.mxu2  ;;  %v1954_v56 = vpop.f32.mrf.mxu0 }
 0x57b   :  { %v1825_v34 = vadd.f32 %v3524_v25, %v1824_v57 }
 0x57c   :  { %2039 = vst [vmem:[#allocation7 + $0x10] sm:$0xff] %v1996_v1 }
 0x57d   :  { %v1868_v45 = vpop.f32.mrf.mxu3 }
 0x57e   :  { %v1869_v0 = vadd.f32 %v1868_v45, %v1804_v12 }
 0x580   :  { %v1934_v30 = vadd.f32 %v1933_v24, %v1869_v0  ;;  %v1822_v24 = vadd.f32 %v3524_v25, %v1821_v44  ;;  %v2019_v27 = vpop.f32.mrf.mxu1 }
 0x582   :  { %v1999_v39 = vadd.f32 %v1998_v49, %v1934_v30  ;;  %v1827_v55 = vpop.f32.mrf.mxu2 }
 0x583   :  { %v1828_v15 = vadd.f32 %v3524_v25, %v1827_v55 }
 0x584   :  { %2040 = vst [vmem:[#allocation7 + $0x18] sm:$0xff] %v1999_v39 }
 0x585   :  { %v1871_v18 = vpop.f32.mrf.mxu3 }
 0x586   :  { %v1872_v11 = vadd.f32 %v1871_v18, %v1807_v33 }
 0x588   :  { %v1937_v29 = vadd.f32 %v1936_v41, %v1872_v11  ;;  %v2022_v2 = vpop.f32.mrf.mxu1 }
 0x58a   :  { %v2002_v19 = vadd.f32 %v2001_v9, %v1937_v29  ;;  %v1957_v9 = vpop.f32.mrf.mxu0  ;;  %v1830_v54 = vpop.f32.mrf.mxu2 }
 0x58b   :  { %v1831_v30 = vadd.f32 %v3524_v25, %v1830_v54 }
 0x58c   :  { %2041 = vst [vmem:[#allocation7 + $0x20] sm:$0xff] %v2002_v19 }
 0x58d   :  { %v1874_v51 = vpop.f32.mrf.mxu3 }
 0x58e   :  { %v1875_v23 = vadd.f32 %v1874_v51, %v1810_v5 }
 0x590   :  { %v1940_v14 = vadd.f32 %v1939_v53, %v1875_v23  ;;  %v2025_v0 = vpop.f32.mrf.mxu1 }
 0x592   :  { %v2005_v62 = vadd.f32 %v2004_v16, %v1940_v14  ;;  %v1960_v16 = vpop.f32.mrf.mxu0  ;;  %v1833_v33 = vpop.f32.mrf.mxu2 }
 0x594   :  { %2042 = vst [vmem:[#allocation7 + $0x28] sm:$0xff] %v2005_v62 }
 0x595   :  { %v1877_v42 = vpop.f32.mrf.mxu3 }
 0x596   :  { %v1878_v60 = vadd.f32 %v1877_v42, %v1813_v13 }
 0x598   :  { %v1943_v32 = vadd.f32 %v1942_v4, %v1878_v60  ;;  %v2028_v29 = vpop.f32.mrf.mxu1 }
 0x59a   :  { %v2008_v36 = vadd.f32 %v2007_v63, %v1943_v32  ;;  %v1963_v11 = vpop.f32.mrf.mxu0  ;;  %v1834_v63 = vadd.f32 %v3524_v25, %v1833_v33  ;;  %v1836_v51 = vpop.f32.mrf.mxu2 }
 0x59c   :  { %2043 = vst [vmem:[#allocation7 + $0x30] sm:$0xff] %v2008_v36 }
 0x59d   :  { %v1880_v59 = vpop.f32.mrf.mxu3 }
 0x59e   :  { %v1881_v46 = vadd.f32 %v1880_v59, %v1816_v38 }
 0x5a0   :  { %v1946_v47 = vadd.f32 %v1945_v35, %v1881_v46  ;;  %v1837_v35 = vadd.f32 %v3524_v25, %v1836_v51  ;;  %v2031_v13 = vpop.f32.mrf.mxu1 }
 0x5a2   :  { %v2011_v8 = vadd.f32 %v2010_v61, %v1946_v47  ;;  %v1966_v14 = vpop.f32.mrf.mxu0  ;;  %v1839_v42 = vpop.f32.mrf.mxu2 }
 0x5a3   :  { %v1840_v32 = vadd.f32 %v3524_v25, %v1839_v42 }
 0x5a4   :  { %2044 = vst [vmem:[#allocation7 + $0x38] sm:$0xff] %v2011_v8 }
 0x5a5   :  { %v1883_v50 = vpop.f32.mrf.mxu3 }
 0x5a6   :  { %v1884_v58 = vadd.f32 %v1883_v50, %v1819_v20 }
 0x5a8   :  { %v1949_v21 = vadd.f32 %v1948_v28, %v1884_v58  ;;  %v2034_v59 = vpop.f32.mrf.mxu1 }
 0x5aa   :  { %v2014_v3 = vadd.f32 %v2013_v10, %v1949_v21  ;;  %v1969_v10 = vpop.f32.mrf.mxu0 }
 0x5ac   :  { %2045 = vst [vmem:[#allocation7 + $0x40] sm:$0xff] %v2014_v3 }
 0x5ad   :  { %v1886_v49 = vpop.f32.mrf.mxu3 }
 0x5ae   :  { %v1887_v48 = vadd.f32 %v1886_v49, %v1822_v24 }
 0x5b0   :  { %v1952_v17 = vadd.f32 %v1951_v26, %v1887_v48 }
 0x5b2   :  { %v2017_v31 = vadd.f32 %v2016_v40, %v1952_v17 }
 0x5b4   :  { %2046 = vst [vmem:[#allocation7 + $0x48] sm:$0xff] %v2017_v31 }
 0x5b5   :  { %v1889_v41 = vpop.f32.mrf.mxu3 }
 0x5b6   :  { %v1890_v7 = vadd.f32 %v1889_v41, %v1825_v34 }
 0x5b8   :  { %v1955_v37 = vadd.f32 %v1954_v56, %v1890_v7 }
 0x5ba   :  { %v2020_v6 = vadd.f32 %v2019_v27, %v1955_v37 }
 0x5bc   :  { %2047 = vst [vmem:[#allocation7 + $0x50] sm:$0xff] %v2020_v6 }
 0x5bd   :  { %v1892_v1 = vpop.f32.mrf.mxu3 }
 0x5be   :  { %v1893_v53 = vadd.f32 %v1892_v1, %v1828_v15 }
 0x5c0   :  { %v1958_v12 = vadd.f32 %v1957_v9, %v1893_v53 }
 0x5c2   :  { %v2023_v45 = vadd.f32 %v2022_v2, %v1958_v12 }
 0x5c4   :  { %2048 = vst [vmem:[#allocation7 + $0x58] sm:$0xff] %v2023_v45 }
 0x5c5   :  { %v1895_v52 = vpop.f32.mrf.mxu3 }
 0x5c6   :  { %v1896_v39 = vadd.f32 %v1895_v52, %v1831_v30 }
 0x5c8   :  { %v1961_v4 = vadd.f32 %v1960_v16, %v1896_v39 }
 0x5ca   :  { %v2026_v18 = vadd.f32 %v2025_v0, %v1961_v4 }
 0x5cc   :  { %2049 = vst [vmem:[#allocation7 + $0x60] sm:$0xff] %v2026_v18 }
 0x5cd   :  { %v1898_v19 = vpop.f32.mrf.mxu3 }
 0x5ce   :  { %v1899_v43 = vadd.f32 %v1898_v19, %v1834_v63 }
 0x5d0   :  { %v1964_v5 = vadd.f32 %v1963_v11, %v1899_v43 }
 0x5d2   :  { %v2029_v23 = vadd.f32 %v2028_v29, %v1964_v5 }
 0x5d4   :  { %2050 = vst [vmem:[#allocation7 + $0x68] sm:$0xff] %v2029_v23 }
 0x5d5   :  { %v1901_v61 = vpop.f32.mrf.mxu3 }
 0x5d6   :  { %v1902_v62 = vadd.f32 %v1901_v61, %v1837_v35 }
 0x5d8   :  { %v1967_v22 = vadd.f32 %v1966_v14, %v1902_v62 }
 0x5da   :  { %v2032_v60 = vadd.f32 %v2031_v13, %v1967_v22 }
 0x5dc   :  { %2051 = vst [vmem:[#allocation7 + $0x70] sm:$0xff] %v2032_v60 }
 0x5dd   :  { %v1904_v28 = vpop.f32.mrf.mxu3 }
 0x5de   :  { %v1905_v36 = vadd.f32 %v1904_v28, %v1840_v32 }
 0x5e0   :  { %v1970_v38 = vadd.f32 %v1969_v10, %v1905_v36 }
 0x5e2   :  { %v2035_v46 = vadd.f32 %v2034_v59, %v1970_v38 }
 0x5e4   :  { %2052 = vst [vmem:[#allocation7 + $0x78] sm:$0xff] %v2035_v46 }
 0x5e5   :  { %2065 = dma.vmem_to_hbm [thread:$0]  %s2058_s23, 2048, %s2060_s4, [#allocation4], %s2414_s15, %s2414_s15, %s2415_s16  }
 0x5e6   :  { %2408 = dma.done.wait [#allocation4], 2048  }
 0x5e7   :  { %2409 = vsyncadd [#allocation4], 4294965248 }
 0x5e8   :  { %2070 = vsyncpa [#allocation3], 1 }
 0x5e9   :  { %2071 = vsyncpa [#allocation6], 1 }
 0x5ea   :  { %2072 = vsyncpa [#allocation4], 1 }

</bundles_post_ra>
